<compile_context>
chip_gen: v6e
topology: v6e:2x2x1
jax: 0.10.0
libtpu: 0.0.40
codegen_flags: <defaults>
</compile_context>

<pallas_src>
import functools

import jax
import jax.numpy as jnp
from jax import lax
from jax.experimental import pallas as pl
from jax.experimental.pallas import tpu as pltpu

# ---- model config (small synthetic shapes) ----
VOCAB = 64
D_MODEL = 32
N_HEADS = 2
HEAD_DIM = D_MODEL // N_HEADS
D_MLP = 64
N_LAYERS = 2
MAX_SEQ = 8
LN_EPS = 1e-5

# ---- packed-parameter layout: one lane-dense (TOTAL_ROWS, 128) f32 slab ----
PACK_LANES = 128
R_POS = 0                        # pos_emb rows [0, MAX_SEQ)
LAYER0_ROW = 8                   # first layer base row (multiple of 8)
R_WQKV = 0                       # + D_MODEL rows, 3*D_MODEL cols
R_WO = R_WQKV + D_MODEL          # + D_MODEL rows, D_MODEL cols
R_W1 = R_WO + D_MODEL            # + D_MODEL rows, D_MLP cols
R_W2 = R_W1 + D_MODEL            # + D_MLP  rows, D_MODEL cols
R_BIAS = R_W2 + D_MLP            # 8 rows: bqkv, bo, b1, b2, ln1g, ln1b, ln2g, ln2b
PER_LAYER_ROWS = R_BIAS + 8      # 168 (multiple of 8)
TOTAL_ROWS = LAYER0_ROW + N_LAYERS * PER_LAYER_ROWS  # 344


# ---------------- single fused Pallas kernel ----------------

def _encoder_kernel(ids_ref, tok_ref, par_ref, o_ref, attn_ref, *, batch, seq):
    bs = batch * seq
    D, M, HD = D_MODEL, D_MLP, HEAD_DIM

    # --- token embedding as one-hot matmul (exact row gather, runs on MXU) ---
    ids = ids_ref[...]                                          # (bs, 1) int32
    vocab_iota = lax.broadcasted_iota(jnp.int32, (bs, VOCAB), 1)
    onehot = (vocab_iota == ids).astype(jnp.bfloat16)           # (bs, VOCAB)
    h = jnp.dot(onehot, tok_ref[...].astype(jnp.bfloat16),
                preferred_element_type=jnp.float32)             # (bs, D) f32

    # --- positional embedding: broadcast add (no concat copies) ---
    pos = par_ref[R_POS:R_POS + seq, 0:D]                       # (seq, D)
    h = (h.reshape(batch, seq, D) + pos).reshape(bs, D)

    def layernorm(x, g, b):
        mean = jnp.mean(x, axis=-1, keepdims=True)
        xc = x - mean
        var = jnp.mean(xc * xc, axis=-1, keepdims=True)
        return xc * lax.rsqrt(var + LN_EPS) * g + b

    scale = 1.0 / (HD ** 0.5)

    for l in range(N_LAYERS):                                   # static unroll
        base = LAYER0_ROW + l * PER_LAYER_ROWS
        # static ref slices into the packed parameter slab (free at runtime)
        wqkv = par_ref[base + R_WQKV:base + R_WQKV + D, 0:3 * D].astype(jnp.bfloat16)
        wo = par_ref[base + R_WO:base + R_WO + D, 0:D].astype(jnp.bfloat16)
        w1 = par_ref[base + R_W1:base + R_W1 + D, 0:M].astype(jnp.bfloat16)
        w2 = par_ref[base + R_W2:base + R_W2 + M, 0:D].astype(jnp.bfloat16)
        bias = base + R_BIAS
        bqkv = par_ref[bias + 0:bias + 1, 0:3 * D]
        bo = par_ref[bias + 1:bias + 2, 0:D]
        b1 = par_ref[bias + 2:bias + 3, 0:M]
        b2 = par_ref[bias + 3:bias + 4, 0:D]
        ln1g = par_ref[bias + 4:bias + 5, 0:D]
        ln1b = par_ref[bias + 5:bias + 6, 0:D]
        ln2g = par_ref[bias + 6:bias + 7, 0:D]
        ln2b = par_ref[bias + 7:bias + 8, 0:D]

        # --- fused QKV projection: one (bs, 3D) matmul, f32 accumulate ---
        qkv = jnp.dot(h.astype(jnp.bfloat16), wqkv,
                      preferred_element_type=jnp.float32) + bqkv
        q = qkv[:, 0:D]
        k = qkv[:, D:2 * D]
        v = qkv[:, 2 * D:3 * D]

        # --- attention: k-transpose folded into MXU contraction, head output
        #     written straight into VMEM scratch (no concats) ---
        for bi in range(batch):
            rs = slice(bi * seq, (bi + 1) * seq)
            for hi in range(N_HEADS):
                cs = slice(hi * HD, (hi + 1) * HD)
                qh = q[rs, cs].astype(jnp.bfloat16)
                kh = k[rs, cs].astype(jnp.bfloat16)
                vh = v[rs, cs].astype(jnp.bfloat16)
                sc = lax.dot_general(
                    qh, kh, (((1,), (1,)), ((), ())),
                    preferred_element_type=jnp.float32) * scale  # q @ k^T
                mx = jnp.max(sc, axis=-1, keepdims=True)
                p = jnp.exp(sc - mx)
                p = p * pl.reciprocal(jnp.sum(p, axis=-1, keepdims=True),
                                      approx=True)
                attn_ref[rs, cs] = jnp.dot(
                    p.astype(jnp.bfloat16), vh,
                    preferred_element_type=jnp.float32)

        # --- output projection + residual + LN (fused epilogue) ---
        y = jnp.dot(attn_ref[...].astype(jnp.bfloat16), wo,
                    preferred_element_type=jnp.float32) + bo
        h = layernorm(h + y, ln1g, ln1b)

        # --- MLP (tanh-approx GELU) + residual + LN (fused epilogue) ---
        # TODO(synk): HF BERT default is exact (erf) GELU; tanh approx here.
        mm = jnp.dot(h.astype(jnp.bfloat16), w1,
                     preferred_element_type=jnp.float32) + b1
        mm = 0.5 * mm * (1.0 + jnp.tanh(
            0.7978845608028654 * (mm + 0.044715 * mm * mm * mm)))
        y2 = jnp.dot(mm.astype(jnp.bfloat16), w2,
                     preferred_element_type=jnp.float32) + b2
        h = layernorm(h + y2, ln2g, ln2b)

    o_ref[...] = h.astype(o_ref.dtype)


# ---------------- parameter init + host-side packing ----------------

def init_params(key):
    def nrm(k, shape, scale=0.02):
        return scale * jax.random.normal(k, shape, jnp.float32)

    k_tok, k_pos, k_qkv, k_o, k_1, k_2 = jax.random.split(key, 6)
    L, D, M = N_LAYERS, D_MODEL, D_MLP
    return {
        "tok_emb": nrm(k_tok, (VOCAB, D)),
        "pos_emb": nrm(k_pos, (MAX_SEQ, D)),
        "wqkv": nrm(k_qkv, (L, D, 3 * D)),
        "bqkv": jnp.zeros((L, 1, 3 * D), jnp.float32),
        "wo": nrm(k_o, (L, D, D)),
        "bo": jnp.zeros((L, 1, D), jnp.float32),
        "w1": nrm(k_1, (L, D, M)),
        "b1": jnp.zeros((L, 1, M), jnp.float32),
        "w2": nrm(k_2, (L, M, D)),
        "b2": jnp.zeros((L, 1, D), jnp.float32),
        "ln1_g": jnp.ones((L, 1, D), jnp.float32),
        "ln1_b": jnp.zeros((L, 1, D), jnp.float32),
        "ln2_g": jnp.ones((L, 1, D), jnp.float32),
        "ln2_b": jnp.zeros((L, 1, D), jnp.float32),
    }


def pack_params(params):
    """Pack pos_emb + all per-layer params into one lane-dense (rows, 128) slab."""
    buf = jnp.zeros((TOTAL_ROWS, PACK_LANES), jnp.float32)
    buf = buf.at[R_POS:R_POS + MAX_SEQ, 0:D_MODEL].set(params["pos_emb"])
    for l in range(N_LAYERS):
        base = LAYER0_ROW + l * PER_LAYER_ROWS
        buf = buf.at[base + R_WQKV:base + R_WQKV + D_MODEL,
                     0:3 * D_MODEL].set(params["wqkv"][l])
        buf = buf.at[base + R_WO:base + R_WO + D_MODEL,
                     0:D_MODEL].set(params["wo"][l])
        buf = buf.at[base + R_W1:base + R_W1 + D_MODEL,
                     0:D_MLP].set(params["w1"][l])
        buf = buf.at[base + R_W2:base + R_W2 + D_MLP,
                     0:D_MODEL].set(params["w2"][l])
        bias = base + R_BIAS
        buf = buf.at[bias + 0, 0:3 * D_MODEL].set(params["bqkv"][l, 0])
        buf = buf.at[bias + 1, 0:D_MODEL].set(params["bo"][l, 0])
        buf = buf.at[bias + 2, 0:D_MLP].set(params["b1"][l, 0])
        buf = buf.at[bias + 3, 0:D_MODEL].set(params["b2"][l, 0])
        buf = buf.at[bias + 4, 0:D_MODEL].set(params["ln1_g"][l, 0])
        buf = buf.at[bias + 5, 0:D_MODEL].set(params["ln1_b"][l, 0])
        buf = buf.at[bias + 6, 0:D_MODEL].set(params["ln2_g"][l, 0])
        buf = buf.at[bias + 7, 0:D_MODEL].set(params["ln2_b"][l, 0])
    return buf


# ---------------- forward (glue) ----------------

def model_forward(tok_emb, packed, input_ids):
    """Equivalent of ModelWrapper.forward: returns last_hidden_state [B, S, D]."""
    b, s = input_ids.shape
    assert s <= MAX_SEQ, (s, MAX_SEQ)
    bs = b * s
    ids2d = input_ids.reshape(bs, 1).astype(jnp.int32)

    out = pl.pallas_call(
        functools.partial(_encoder_kernel, batch=b, seq=s),
        out_shape=jax.ShapeDtypeStruct((bs, D_MODEL), jnp.float32),
        grid=(1,),
        in_specs=[
            pl.BlockSpec((bs, 1), lambda i: (0, 0)),                    # ids
            pl.BlockSpec((VOCAB, D_MODEL), lambda i: (0, 0)),           # tok_emb
            pl.BlockSpec((TOTAL_ROWS, PACK_LANES), lambda i: (0, 0)),   # packed params
        ],
        out_specs=pl.BlockSpec((bs, D_MODEL), lambda i: (0, 0)),
        scratch_shapes=[pltpu.VMEM((bs, D_MODEL), jnp.float32)],        # attn scratch
        compiler_params=pltpu.CompilerParams(
            dimension_semantics=("arbitrary",)),
    )(ids2d, tok_emb, packed)

    return out.reshape(b, s, D_MODEL)  # last_hidden_state
    # TODO(synk): ModelWrapper.forward takes only input_ids; no attention_mask
    # handling — full-length sequences are assumed.


if __name__ == "__main__":
    key = jax.random.PRNGKey(0)
    pkey, ikey = jax.random.split(key)
    params = init_params(pkey)
    packed = pack_params(params)

    B, S = 2, 8
    input_ids = jax.random.randint(ikey, (B, S), 0, VOCAB, dtype=jnp.int32)

    out = jax.jit(model_forward)(params["tok_emb"], packed, input_ids)
    out = jax.block_until_ready(out)

    assert out.shape == (B, S, D_MODEL), out.shape
    assert out.dtype == jnp.float32
    assert bool(jnp.all(jnp.isfinite(out)))
    print("KERNEL_OK")
</pallas_src>

<mosaic_0001>
module attributes {stable_mosaic.version = 11 : i64} {
  func.func @_encoder_kernel(%arg0: i32, %arg1: memref<16x1xi32, #tpu.memory_space<vmem>>, %arg2: memref<64x32xf32, #tpu.memory_space<vmem>>, %arg3: memref<344x128xf32, #tpu.memory_space<vmem>>, %arg4: memref<16x32xf32, #tpu.memory_space<vmem>>, %arg5: memref<16x32xf32, #tpu.memory_space<vmem>>) attributes {dimension_semantics = [#tpu.dimension_semantics<arbitrary>], iteration_bounds = array<i64: 1>, scalar_prefetch = 0 : i64, scratch_operands = 1 : i64, tpu.core_type = #tpu.core_type<tc>, window_params = [{pipeline_mode = #tpu.pipeline_mode<synchronous>, transform_indices = @transform_0, window_bounds = array<i64: 16, 1>}, {pipeline_mode = #tpu.pipeline_mode<synchronous>, transform_indices = @transform_1, window_bounds = array<i64: 64, 32>}, {pipeline_mode = #tpu.pipeline_mode<synchronous>, transform_indices = @transform_2, window_bounds = array<i64: 344, 128>}, {pipeline_mode = #tpu.pipeline_mode<synchronous>, transform_indices = @transform_3, window_bounds = array<i64: 16, 32>}]} {
    %c0 = arith.constant 0 : index
    %c0_0 = arith.constant 0 : index
    %0 = vector.load %arg1[%c0, %c0_0] : memref<16x1xi32, #tpu.memory_space<vmem>>, vector<16x1xi32>
    %1 = tpu.iota {dimensions = array<i32: 1>} : vector<16x64xi32>
    %2 = vector.broadcast %0 : vector<16x1xi32> to vector<16x64xi32>
    %3 = arith.cmpi eq, %1, %2 : vector<16x64xi32>
    %4 = arith.extui %3 : vector<16x64xi1> to vector<16x64xi32>
    %5 = arith.sitofp %4 : vector<16x64xi32> to vector<16x64xf32>
    %6 = arith.truncf %5 : vector<16x64xf32> to vector<16x64xbf16>
    %c0_1 = arith.constant 0 : index
    %c0_2 = arith.constant 0 : index
    %7 = vector.load %arg2[%c0_1, %c0_2] : memref<64x32xf32, #tpu.memory_space<vmem>>, vector<64x32xf32>
    %8 = arith.truncf %7 : vector<64x32xf32> to vector<64x32xbf16>
    %cst = arith.constant dense<0.000000e+00> : vector<16x32xf32>
    %9 = tpu.matmul %6, %8, %cst {dimension_numbers = #tpu.dot_dimension_numbers<[1], [0], [0], [1], [0, 0, 1, 1], [], []>} : vector<16x64xbf16>, vector<64x32xbf16>, vector<16x32xf32> -> vector<16x32xf32>
    %c0_3 = arith.constant 0 : index
    %c0_4 = arith.constant 0 : index
    %10 = vector.load %arg3[%c0_3, %c0_4] : memref<344x128xf32, #tpu.memory_space<vmem>>, vector<8x32xf32>
    %11 = vector.shape_cast %9 : vector<16x32xf32> to vector<2x8x32xf32>
    %12 = vector.shape_cast %10 : vector<8x32xf32> to vector<1x8x32xf32>
    %13 = vector.broadcast %12 : vector<1x8x32xf32> to vector<2x8x32xf32>
    %14 = arith.addf %11, %13 : vector<2x8x32xf32>
    %15 = vector.shape_cast %14 : vector<2x8x32xf32> to vector<16x32xf32>
    %c8 = arith.constant 8 : index
    %c0_5 = arith.constant 0 : index
    %16 = vector.load %arg3[%c8, %c0_5] : memref<344x128xf32, #tpu.memory_space<vmem>>, vector<32x96xf32>
    %17 = arith.truncf %16 : vector<32x96xf32> to vector<32x96xbf16>
    %c40 = arith.constant 40 : index
    %c0_6 = arith.constant 0 : index
    %18 = vector.load %arg3[%c40, %c0_6] : memref<344x128xf32, #tpu.memory_space<vmem>>, vector<32x32xf32>
    %19 = arith.truncf %18 : vector<32x32xf32> to vector<32x32xbf16>
    %c72 = arith.constant 72 : index
    %c0_7 = arith.constant 0 : index
    %20 = vector.load %arg3[%c72, %c0_7] : memref<344x128xf32, #tpu.memory_space<vmem>>, vector<32x64xf32>
    %21 = arith.truncf %20 : vector<32x64xf32> to vector<32x64xbf16>
    %c104 = arith.constant 104 : index
    %c0_8 = arith.constant 0 : index
    %22 = vector.load %arg3[%c104, %c0_8] : memref<344x128xf32, #tpu.memory_space<vmem>>, vector<64x32xf32>
    %23 = arith.truncf %22 : vector<64x32xf32> to vector<64x32xbf16>
    %c168 = arith.constant 168 : index
    %c0_9 = arith.constant 0 : index
    %24 = vector.load %arg3[%c168, %c0_9] : memref<344x128xf32, #tpu.memory_space<vmem>>, vector<1x96xf32>
    %c169 = arith.constant 169 : index
    %c0_10 = arith.constant 0 : index
    %25 = vector.load %arg3[%c169, %c0_10] : memref<344x128xf32, #tpu.memory_space<vmem>>, vector<1x32xf32>
    %c170 = arith.constant 170 : index
    %c0_11 = arith.constant 0 : index
    %26 = vector.load %arg3[%c170, %c0_11] : memref<344x128xf32, #tpu.memory_space<vmem>>, vector<1x64xf32>
    %c171 = arith.constant 171 : index
    %c0_12 = arith.constant 0 : index
    %27 = vector.load %arg3[%c171, %c0_12] : memref<344x128xf32, #tpu.memory_space<vmem>>, vector<1x32xf32>
    %c172 = arith.constant 172 : index
    %c0_13 = arith.constant 0 : index
    %28 = vector.load %arg3[%c172, %c0_13] : memref<344x128xf32, #tpu.memory_space<vmem>>, vector<1x32xf32>
    %c173 = arith.constant 173 : index
    %c0_14 = arith.constant 0 : index
    %29 = vector.load %arg3[%c173, %c0_14] : memref<344x128xf32, #tpu.memory_space<vmem>>, vector<1x32xf32>
    %c174 = arith.constant 174 : index
    %c0_15 = arith.constant 0 : index
    %30 = vector.load %arg3[%c174, %c0_15] : memref<344x128xf32, #tpu.memory_space<vmem>>, vector<1x32xf32>
    %c175 = arith.constant 175 : index
    %c0_16 = arith.constant 0 : index
    %31 = vector.load %arg3[%c175, %c0_16] : memref<344x128xf32, #tpu.memory_space<vmem>>, vector<1x32xf32>
    %32 = arith.truncf %15 : vector<16x32xf32> to vector<16x32xbf16>
    %cst_17 = arith.constant dense<0.000000e+00> : vector<16x96xf32>
    %33 = tpu.matmul %32, %17, %cst_17 {dimension_numbers = #tpu.dot_dimension_numbers<[1], [0], [0], [1], [0, 0, 1, 1], [], []>} : vector<16x32xbf16>, vector<32x96xbf16>, vector<16x96xf32> -> vector<16x96xf32>
    %34 = vector.broadcast %24 : vector<1x96xf32> to vector<16x96xf32>
    %35 = arith.addf %33, %34 : vector<16x96xf32>
    %36 = vector.extract_strided_slice %35 {offsets = [0, 0], sizes = [16, 32], strides = [1, 1]} : vector<16x96xf32> to vector<16x32xf32>
    %37 = vector.extract_strided_slice %35 {offsets = [0, 32], sizes = [16, 32], strides = [1, 1]} : vector<16x96xf32> to vector<16x32xf32>
    %38 = vector.extract_strided_slice %35 {offsets = [0, 64], sizes = [16, 32], strides = [1, 1]} : vector<16x96xf32> to vector<16x32xf32>
    %39 = vector.extract_strided_slice %36 {offsets = [0, 0], sizes = [8, 16], strides = [1, 1]} : vector<16x32xf32> to vector<8x16xf32>
    %40 = arith.truncf %39 : vector<8x16xf32> to vector<8x16xbf16>
    %41 = vector.extract_strided_slice %37 {offsets = [0, 0], sizes = [8, 16], strides = [1, 1]} : vector<16x32xf32> to vector<8x16xf32>
    %42 = arith.truncf %41 : vector<8x16xf32> to vector<8x16xbf16>
    %43 = vector.extract_strided_slice %38 {offsets = [0, 0], sizes = [8, 16], strides = [1, 1]} : vector<16x32xf32> to vector<8x16xf32>
    %44 = arith.truncf %43 : vector<8x16xf32> to vector<8x16xbf16>
    %cst_18 = arith.constant dense<0.000000e+00> : vector<8x8xf32>
    %45 = tpu.matmul %40, %42, %cst_18 {dimension_numbers = #tpu.dot_dimension_numbers<[1], [1], [0], [0], [0, 0, 1, 0], [], []>} : vector<8x16xbf16>, vector<8x16xbf16>, vector<8x8xf32> -> vector<8x8xf32>
    %cst_19 = arith.constant 2.500000e-01 : f32
    %46 = vector.broadcast %cst_19 : f32 to vector<8x8xf32>
    %47 = arith.mulf %45, %46 : vector<8x8xf32>
    %cst_20 = arith.constant dense<0xFF800000> : vector<8xf32>
    %48 = vector.multi_reduction <maximumf>, %47, %cst_20 [1] : vector<8x8xf32> to vector<8xf32>
    %49 = vector.shape_cast %48 : vector<8xf32> to vector<8x1xf32>
    %50 = vector.broadcast %49 : vector<8x1xf32> to vector<8x8xf32>
    %51 = arith.subf %47, %50 : vector<8x8xf32>
    %52 = math.exp %51 : vector<8x8xf32>
    %cst_21 = arith.constant dense<0.000000e+00> : vector<8xf32>
    %53 = vector.multi_reduction <add>, %52, %cst_21 [1] : vector<8x8xf32> to vector<8xf32>
    %54 = vector.shape_cast %53 : vector<8xf32> to vector<8x1xf32>
    %55 = tpu.reciprocal %54 {approx = true} : vector<8x1xf32> -> vector<8x1xf32>
    %56 = vector.broadcast %55 : vector<8x1xf32> to vector<8x8xf32>
    %57 = arith.mulf %52, %56 : vector<8x8xf32>
    %58 = arith.truncf %57 : vector<8x8xf32> to vector<8x8xbf16>
    %cst_22 = arith.constant dense<0.000000e+00> : vector<8x16xf32>
    %59 = tpu.matmul %58, %44, %cst_22 {dimension_numbers = #tpu.dot_dimension_numbers<[1], [0], [0], [1], [0, 0, 1, 1], [], []>} : vector<8x8xbf16>, vector<8x16xbf16>, vector<8x16xf32> -> vector<8x16xf32>
    %c0_23 = arith.constant 0 : index
    %c0_24 = arith.constant 0 : index
    %60 = vector.load %arg5[%c0_23, %c0_24] : memref<16x32xf32, #tpu.memory_space<vmem>>, vector<8x16xf32>
    tpu.vector_store %arg5[%c0_23, %c0_24], %59 {strides = array<i32>} : memref<16x32xf32, #tpu.memory_space<vmem>>, vector<8x16xf32>,
    %61 = vector.extract_strided_slice %36 {offsets = [0, 16], sizes = [8, 16], strides = [1, 1]} : vector<16x32xf32> to vector<8x16xf32>
    %62 = arith.truncf %61 : vector<8x16xf32> to vector<8x16xbf16>
    %63 = vector.extract_strided_slice %37 {offsets = [0, 16], sizes = [8, 16], strides = [1, 1]} : vector<16x32xf32> to vector<8x16xf32>
    %64 = arith.truncf %63 : vector<8x16xf32> to vector<8x16xbf16>
    %65 = vector.extract_strided_slice %38 {offsets = [0, 16], sizes = [8, 16], strides = [1, 1]} : vector<16x32xf32> to vector<8x16xf32>
    %66 = arith.truncf %65 : vector<8x16xf32> to vector<8x16xbf16>
    %cst_25 = arith.constant dense<0.000000e+00> : vector<8x8xf32>
    %67 = tpu.matmul %62, %64, %cst_25 {dimension_numbers = #tpu.dot_dimension_numbers<[1], [1], [0], [0], [0, 0, 1, 0], [], []>} : vector<8x16xbf16>, vector<8x16xbf16>, vector<8x8xf32> -> vector<8x8xf32>
    %cst_26 = arith.constant 2.500000e-01 : f32
    %68 = vector.broadcast %cst_26 : f32 to vector<8x8xf32>
    %69 = arith.mulf %67, %68 : vector<8x8xf32>
    %cst_27 = arith.constant dense<0xFF800000> : vector<8xf32>
    %70 = vector.multi_reduction <maximumf>, %69, %cst_27 [1] : vector<8x8xf32> to vector<8xf32>
    %71 = vector.shape_cast %70 : vector<8xf32> to vector<8x1xf32>
    %72 = vector.broadcast %71 : vector<8x1xf32> to vector<8x8xf32>
    %73 = arith.subf %69, %72 : vector<8x8xf32>
    %74 = math.exp %73 : vector<8x8xf32>
    %cst_28 = arith.constant dense<0.000000e+00> : vector<8xf32>
    %75 = vector.multi_reduction <add>, %74, %cst_28 [1] : vector<8x8xf32> to vector<8xf32>
    %76 = vector.shape_cast %75 : vector<8xf32> to vector<8x1xf32>
    %77 = tpu.reciprocal %76 {approx = true} : vector<8x1xf32> -> vector<8x1xf32>
    %78 = vector.broadcast %77 : vector<8x1xf32> to vector<8x8xf32>
    %79 = arith.mulf %74, %78 : vector<8x8xf32>
    %80 = arith.truncf %79 : vector<8x8xf32> to vector<8x8xbf16>
    %cst_29 = arith.constant dense<0.000000e+00> : vector<8x16xf32>
    %81 = tpu.matmul %80, %66, %cst_29 {dimension_numbers = #tpu.dot_dimension_numbers<[1], [0], [0], [1], [0, 0, 1, 1], [], []>} : vector<8x8xbf16>, vector<8x16xbf16>, vector<8x16xf32> -> vector<8x16xf32>
    %c0_30 = arith.constant 0 : index
    %c16 = arith.constant 16 : index
    %82 = vector.load %arg5[%c0_30, %c16] : memref<16x32xf32, #tpu.memory_space<vmem>>, vector<8x16xf32>
    tpu.vector_store %arg5[%c0_30, %c16], %81 {strides = array<i32>} : memref<16x32xf32, #tpu.memory_space<vmem>>, vector<8x16xf32>,
    %83 = vector.extract_strided_slice %36 {offsets = [8, 0], sizes = [8, 16], strides = [1, 1]} : vector<16x32xf32> to vector<8x16xf32>
    %84 = arith.truncf %83 : vector<8x16xf32> to vector<8x16xbf16>
    %85 = vector.extract_strided_slice %37 {offsets = [8, 0], sizes = [8, 16], strides = [1, 1]} : vector<16x32xf32> to vector<8x16xf32>
    %86 = arith.truncf %85 : vector<8x16xf32> to vector<8x16xbf16>
    %87 = vector.extract_strided_slice %38 {offsets = [8, 0], sizes = [8, 16], strides = [1, 1]} : vector<16x32xf32> to vector<8x16xf32>
    %88 = arith.truncf %87 : vector<8x16xf32> to vector<8x16xbf16>
    %cst_31 = arith.constant dense<0.000000e+00> : vector<8x8xf32>
    %89 = tpu.matmul %84, %86, %cst_31 {dimension_numbers = #tpu.dot_dimension_numbers<[1], [1], [0], [0], [0, 0, 1, 0], [], []>} : vector<8x16xbf16>, vector<8x16xbf16>, vector<8x8xf32> -> vector<8x8xf32>
    %cst_32 = arith.constant 2.500000e-01 : f32
    %90 = vector.broadcast %cst_32 : f32 to vector<8x8xf32>
    %91 = arith.mulf %89, %90 : vector<8x8xf32>
    %cst_33 = arith.constant dense<0xFF800000> : vector<8xf32>
    %92 = vector.multi_reduction <maximumf>, %91, %cst_33 [1] : vector<8x8xf32> to vector<8xf32>
    %93 = vector.shape_cast %92 : vector<8xf32> to vector<8x1xf32>
    %94 = vector.broadcast %93 : vector<8x1xf32> to vector<8x8xf32>
    %95 = arith.subf %91, %94 : vector<8x8xf32>
    %96 = math.exp %95 : vector<8x8xf32>
    %cst_34 = arith.constant dense<0.000000e+00> : vector<8xf32>
    %97 = vector.multi_reduction <add>, %96, %cst_34 [1] : vector<8x8xf32> to vector<8xf32>
    %98 = vector.shape_cast %97 : vector<8xf32> to vector<8x1xf32>
    %99 = tpu.reciprocal %98 {approx = true} : vector<8x1xf32> -> vector<8x1xf32>
    %100 = vector.broadcast %99 : vector<8x1xf32> to vector<8x8xf32>
    %101 = arith.mulf %96, %100 : vector<8x8xf32>
    %102 = arith.truncf %101 : vector<8x8xf32> to vector<8x8xbf16>
    %cst_35 = arith.constant dense<0.000000e+00> : vector<8x16xf32>
    %103 = tpu.matmul %102, %88, %cst_35 {dimension_numbers = #tpu.dot_dimension_numbers<[1], [0], [0], [1], [0, 0, 1, 1], [], []>} : vector<8x8xbf16>, vector<8x16xbf16>, vector<8x16xf32> -> vector<8x16xf32>
    %c8_36 = arith.constant 8 : index
    %c0_37 = arith.constant 0 : index
    %104 = vector.load %arg5[%c8_36, %c0_37] : memref<16x32xf32, #tpu.memory_space<vmem>>, vector<8x16xf32>
    tpu.vector_store %arg5[%c8_36, %c0_37], %103 {strides = array<i32>} : memref<16x32xf32, #tpu.memory_space<vmem>>, vector<8x16xf32>,
    %105 = vector.extract_strided_slice %36 {offsets = [8, 16], sizes = [8, 16], strides = [1, 1]} : vector<16x32xf32> to vector<8x16xf32>
    %106 = arith.truncf %105 : vector<8x16xf32> to vector<8x16xbf16>
    %107 = vector.extract_strided_slice %37 {offsets = [8, 16], sizes = [8, 16], strides = [1, 1]} : vector<16x32xf32> to vector<8x16xf32>
    %108 = arith.truncf %107 : vector<8x16xf32> to vector<8x16xbf16>
    %109 = vector.extract_strided_slice %38 {offsets = [8, 16], sizes = [8, 16], strides = [1, 1]} : vector<16x32xf32> to vector<8x16xf32>
    %110 = arith.truncf %109 : vector<8x16xf32> to vector<8x16xbf16>
    %cst_38 = arith.constant dense<0.000000e+00> : vector<8x8xf32>
    %111 = tpu.matmul %106, %108, %cst_38 {dimension_numbers = #tpu.dot_dimension_numbers<[1], [1], [0], [0], [0, 0, 1, 0], [], []>} : vector<8x16xbf16>, vector<8x16xbf16>, vector<8x8xf32> -> vector<8x8xf32>
    %cst_39 = arith.constant 2.500000e-01 : f32
    %112 = vector.broadcast %cst_39 : f32 to vector<8x8xf32>
    %113 = arith.mulf %111, %112 : vector<8x8xf32>
    %cst_40 = arith.constant dense<0xFF800000> : vector<8xf32>
    %114 = vector.multi_reduction <maximumf>, %113, %cst_40 [1] : vector<8x8xf32> to vector<8xf32>
    %115 = vector.shape_cast %114 : vector<8xf32> to vector<8x1xf32>
    %116 = vector.broadcast %115 : vector<8x1xf32> to vector<8x8xf32>
    %117 = arith.subf %113, %116 : vector<8x8xf32>
    %118 = math.exp %117 : vector<8x8xf32>
    %cst_41 = arith.constant dense<0.000000e+00> : vector<8xf32>
    %119 = vector.multi_reduction <add>, %118, %cst_41 [1] : vector<8x8xf32> to vector<8xf32>
    %120 = vector.shape_cast %119 : vector<8xf32> to vector<8x1xf32>
    %121 = tpu.reciprocal %120 {approx = true} : vector<8x1xf32> -> vector<8x1xf32>
    %122 = vector.broadcast %121 : vector<8x1xf32> to vector<8x8xf32>
    %123 = arith.mulf %118, %122 : vector<8x8xf32>
    %124 = arith.truncf %123 : vector<8x8xf32> to vector<8x8xbf16>
    %cst_42 = arith.constant dense<0.000000e+00> : vector<8x16xf32>
    %125 = tpu.matmul %124, %110, %cst_42 {dimension_numbers = #tpu.dot_dimension_numbers<[1], [0], [0], [1], [0, 0, 1, 1], [], []>} : vector<8x8xbf16>, vector<8x16xbf16>, vector<8x16xf32> -> vector<8x16xf32>
    %c8_43 = arith.constant 8 : index
    %c16_44 = arith.constant 16 : index
    %126 = vector.load %arg5[%c8_43, %c16_44] : memref<16x32xf32, #tpu.memory_space<vmem>>, vector<8x16xf32>
    tpu.vector_store %arg5[%c8_43, %c16_44], %125 {strides = array<i32>} : memref<16x32xf32, #tpu.memory_space<vmem>>, vector<8x16xf32>,
    %c0_45 = arith.constant 0 : index
    %c0_46 = arith.constant 0 : index
    %127 = vector.load %arg5[%c0_45, %c0_46] : memref<16x32xf32, #tpu.memory_space<vmem>>, vector<16x32xf32>
    %128 = arith.truncf %127 : vector<16x32xf32> to vector<16x32xbf16>
    %cst_47 = arith.constant dense<0.000000e+00> : vector<16x32xf32>
    %129 = tpu.matmul %128, %19, %cst_47 {dimension_numbers = #tpu.dot_dimension_numbers<[1], [0], [0], [1], [0, 0, 1, 1], [], []>} : vector<16x32xbf16>, vector<32x32xbf16>, vector<16x32xf32> -> vector<16x32xf32>
    %130 = vector.broadcast %25 : vector<1x32xf32> to vector<16x32xf32>
    %131 = arith.addf %129, %130 : vector<16x32xf32>
    %132 = arith.addf %15, %131 : vector<16x32xf32>
    %cst_48 = arith.constant dense<0.000000e+00> : vector<16xf32>
    %133 = vector.multi_reduction <add>, %132, %cst_48 [1] : vector<16x32xf32> to vector<16xf32>
    %134 = vector.shape_cast %133 : vector<16xf32> to vector<16x1xf32>
    %cst_49 = arith.constant 3.200000e+01 : f32
    %135 = vector.broadcast %cst_49 : f32 to vector<16x1xf32>
    %136 = arith.divf %134, %135 : vector<16x1xf32>
    %137 = vector.broadcast %136 : vector<16x1xf32> to vector<16x32xf32>
    %138 = arith.subf %132, %137 : vector<16x32xf32>
    %139 = arith.mulf %138, %138 : vector<16x32xf32>
    %cst_50 = arith.constant dense<0.000000e+00> : vector<16xf32>
    %140 = vector.multi_reduction <add>, %139, %cst_50 [1] : vector<16x32xf32> to vector<16xf32>
    %141 = vector.shape_cast %140 : vector<16xf32> to vector<16x1xf32>
    %cst_51 = arith.constant 3.200000e+01 : f32
    %142 = vector.broadcast %cst_51 : f32 to vector<16x1xf32>
    %143 = arith.divf %141, %142 : vector<16x1xf32>
    %cst_52 = arith.constant 9.99999974E-6 : f32
    %144 = vector.broadcast %cst_52 : f32 to vector<16x1xf32>
    %145 = arith.addf %143, %144 : vector<16x1xf32>
    %146 = math.rsqrt %145 : vector<16x1xf32>
    %147 = vector.broadcast %146 : vector<16x1xf32> to vector<16x32xf32>
    %148 = arith.mulf %138, %147 : vector<16x32xf32>
    %149 = vector.broadcast %28 : vector<1x32xf32> to vector<16x32xf32>
    %150 = arith.mulf %148, %149 : vector<16x32xf32>
    %151 = vector.broadcast %29 : vector<1x32xf32> to vector<16x32xf32>
    %152 = arith.addf %150, %151 : vector<16x32xf32>
    %153 = arith.truncf %152 : vector<16x32xf32> to vector<16x32xbf16>
    %cst_53 = arith.constant dense<0.000000e+00> : vector<16x64xf32>
    %154 = tpu.matmul %153, %21, %cst_53 {dimension_numbers = #tpu.dot_dimension_numbers<[1], [0], [0], [1], [0, 0, 1, 1], [], []>} : vector<16x32xbf16>, vector<32x64xbf16>, vector<16x64xf32> -> vector<16x64xf32>
    %155 = vector.broadcast %26 : vector<1x64xf32> to vector<16x64xf32>
    %156 = arith.addf %154, %155 : vector<16x64xf32>
    %cst_54 = arith.constant 5.000000e-01 : f32
    %157 = vector.broadcast %cst_54 : f32 to vector<16x64xf32>
    %158 = arith.mulf %157, %156 : vector<16x64xf32>
    %cst_55 = arith.constant 4.471500e-02 : f32
    %159 = vector.broadcast %cst_55 : f32 to vector<16x64xf32>
    %160 = arith.mulf %159, %156 : vector<16x64xf32>
    %161 = arith.mulf %160, %156 : vector<16x64xf32>
    %162 = arith.mulf %161, %156 : vector<16x64xf32>
    %163 = arith.addf %156, %162 : vector<16x64xf32>
    %cst_56 = arith.constant 0.797884583 : f32
    %164 = vector.broadcast %cst_56 : f32 to vector<16x64xf32>
    %165 = arith.mulf %164, %163 : vector<16x64xf32>
    %166 = math.tanh %165 : vector<16x64xf32>
    %cst_57 = arith.constant 1.000000e+00 : f32
    %167 = vector.broadcast %cst_57 : f32 to vector<16x64xf32>
    %168 = arith.addf %167, %166 : vector<16x64xf32>
    %169 = arith.mulf %158, %168 : vector<16x64xf32>
    %170 = arith.truncf %169 : vector<16x64xf32> to vector<16x64xbf16>
    %cst_58 = arith.constant dense<0.000000e+00> : vector<16x32xf32>
    %171 = tpu.matmul %170, %23, %cst_58 {dimension_numbers = #tpu.dot_dimension_numbers<[1], [0], [0], [1], [0, 0, 1, 1], [], []>} : vector<16x64xbf16>, vector<64x32xbf16>, vector<16x32xf32> -> vector<16x32xf32>
    %172 = vector.broadcast %27 : vector<1x32xf32> to vector<16x32xf32>
    %173 = arith.addf %171, %172 : vector<16x32xf32>
    %174 = arith.addf %152, %173 : vector<16x32xf32>
    %cst_59 = arith.constant dense<0.000000e+00> : vector<16xf32>
    %175 = vector.multi_reduction <add>, %174, %cst_59 [1] : vector<16x32xf32> to vector<16xf32>
    %176 = vector.shape_cast %175 : vector<16xf32> to vector<16x1xf32>
    %cst_60 = arith.constant 3.200000e+01 : f32
    %177 = vector.broadcast %cst_60 : f32 to vector<16x1xf32>
    %178 = arith.divf %176, %177 : vector<16x1xf32>
    %179 = vector.broadcast %178 : vector<16x1xf32> to vector<16x32xf32>
    %180 = arith.subf %174, %179 : vector<16x32xf32>
    %181 = arith.mulf %180, %180 : vector<16x32xf32>
    %cst_61 = arith.constant dense<0.000000e+00> : vector<16xf32>
    %182 = vector.multi_reduction <add>, %181, %cst_61 [1] : vector<16x32xf32> to vector<16xf32>
    %183 = vector.shape_cast %182 : vector<16xf32> to vector<16x1xf32>
    %cst_62 = arith.constant 3.200000e+01 : f32
    %184 = vector.broadcast %cst_62 : f32 to vector<16x1xf32>
    %185 = arith.divf %183, %184 : vector<16x1xf32>
    %cst_63 = arith.constant 9.99999974E-6 : f32
    %186 = vector.broadcast %cst_63 : f32 to vector<16x1xf32>
    %187 = arith.addf %185, %186 : vector<16x1xf32>
    %188 = math.rsqrt %187 : vector<16x1xf32>
    %189 = vector.broadcast %188 : vector<16x1xf32> to vector<16x32xf32>
    %190 = arith.mulf %180, %189 : vector<16x32xf32>
    %191 = vector.broadcast %30 : vector<1x32xf32> to vector<16x32xf32>
    %192 = arith.mulf %190, %191 : vector<16x32xf32>
    %193 = vector.broadcast %31 : vector<1x32xf32> to vector<16x32xf32>
    %194 = arith.addf %192, %193 : vector<16x32xf32>
    %c176 = arith.constant 176 : index
    %c0_64 = arith.constant 0 : index
    %195 = vector.load %arg3[%c176, %c0_64] : memref<344x128xf32, #tpu.memory_space<vmem>>, vector<32x96xf32>
    %196 = arith.truncf %195 : vector<32x96xf32> to vector<32x96xbf16>
    %c208 = arith.constant 208 : index
    %c0_65 = arith.constant 0 : index
    %197 = vector.load %arg3[%c208, %c0_65] : memref<344x128xf32, #tpu.memory_space<vmem>>, vector<32x32xf32>
    %198 = arith.truncf %197 : vector<32x32xf32> to vector<32x32xbf16>
    %c240 = arith.constant 240 : index
    %c0_66 = arith.constant 0 : index
    %199 = vector.load %arg3[%c240, %c0_66] : memref<344x128xf32, #tpu.memory_space<vmem>>, vector<32x64xf32>
    %200 = arith.truncf %199 : vector<32x64xf32> to vector<32x64xbf16>
    %c272 = arith.constant 272 : index
    %c0_67 = arith.constant 0 : index
    %201 = vector.load %arg3[%c272, %c0_67] : memref<344x128xf32, #tpu.memory_space<vmem>>, vector<64x32xf32>
    %202 = arith.truncf %201 : vector<64x32xf32> to vector<64x32xbf16>
    %c336 = arith.constant 336 : index
    %c0_68 = arith.constant 0 : index
    %203 = vector.load %arg3[%c336, %c0_68] : memref<344x128xf32, #tpu.memory_space<vmem>>, vector<1x96xf32>
    %c337 = arith.constant 337 : index
    %c0_69 = arith.constant 0 : index
    %204 = vector.load %arg3[%c337, %c0_69] : memref<344x128xf32, #tpu.memory_space<vmem>>, vector<1x32xf32>
    %c338 = arith.constant 338 : index
    %c0_70 = arith.constant 0 : index
    %205 = vector.load %arg3[%c338, %c0_70] : memref<344x128xf32, #tpu.memory_space<vmem>>, vector<1x64xf32>
    %c339 = arith.constant 339 : index
    %c0_71 = arith.constant 0 : index
    %206 = vector.load %arg3[%c339, %c0_71] : memref<344x128xf32, #tpu.memory_space<vmem>>, vector<1x32xf32>
    %c340 = arith.constant 340 : index
    %c0_72 = arith.constant 0 : index
    %207 = vector.load %arg3[%c340, %c0_72] : memref<344x128xf32, #tpu.memory_space<vmem>>, vector<1x32xf32>
    %c341 = arith.constant 341 : index
    %c0_73 = arith.constant 0 : index
    %208 = vector.load %arg3[%c341, %c0_73] : memref<344x128xf32, #tpu.memory_space<vmem>>, vector<1x32xf32>
    %c342 = arith.constant 342 : index
    %c0_74 = arith.constant 0 : index
    %209 = vector.load %arg3[%c342, %c0_74] : memref<344x128xf32, #tpu.memory_space<vmem>>, vector<1x32xf32>
    %c343 = arith.constant 343 : index
    %c0_75 = arith.constant 0 : index
    %210 = vector.load %arg3[%c343, %c0_75] : memref<344x128xf32, #tpu.memory_space<vmem>>, vector<1x32xf32>
    %211 = arith.truncf %194 : vector<16x32xf32> to vector<16x32xbf16>
    %cst_76 = arith.constant dense<0.000000e+00> : vector<16x96xf32>
    %212 = tpu.matmul %211, %196, %cst_76 {dimension_numbers = #tpu.dot_dimension_numbers<[1], [0], [0], [1], [0, 0, 1, 1], [], []>} : vector<16x32xbf16>, vector<32x96xbf16>, vector<16x96xf32> -> vector<16x96xf32>
    %213 = vector.broadcast %203 : vector<1x96xf32> to vector<16x96xf32>
    %214 = arith.addf %212, %213 : vector<16x96xf32>
    %215 = vector.extract_strided_slice %214 {offsets = [0, 0], sizes = [16, 32], strides = [1, 1]} : vector<16x96xf32> to vector<16x32xf32>
    %216 = vector.extract_strided_slice %214 {offsets = [0, 32], sizes = [16, 32], strides = [1, 1]} : vector<16x96xf32> to vector<16x32xf32>
    %217 = vector.extract_strided_slice %214 {offsets = [0, 64], sizes = [16, 32], strides = [1, 1]} : vector<16x96xf32> to vector<16x32xf32>
    %218 = vector.extract_strided_slice %215 {offsets = [0, 0], sizes = [8, 16], strides = [1, 1]} : vector<16x32xf32> to vector<8x16xf32>
    %219 = arith.truncf %218 : vector<8x16xf32> to vector<8x16xbf16>
    %220 = vector.extract_strided_slice %216 {offsets = [0, 0], sizes = [8, 16], strides = [1, 1]} : vector<16x32xf32> to vector<8x16xf32>
    %221 = arith.truncf %220 : vector<8x16xf32> to vector<8x16xbf16>
    %222 = vector.extract_strided_slice %217 {offsets = [0, 0], sizes = [8, 16], strides = [1, 1]} : vector<16x32xf32> to vector<8x16xf32>
    %223 = arith.truncf %222 : vector<8x16xf32> to vector<8x16xbf16>
    %cst_77 = arith.constant dense<0.000000e+00> : vector<8x8xf32>
    %224 = tpu.matmul %219, %221, %cst_77 {dimension_numbers = #tpu.dot_dimension_numbers<[1], [1], [0], [0], [0, 0, 1, 0], [], []>} : vector<8x16xbf16>, vector<8x16xbf16>, vector<8x8xf32> -> vector<8x8xf32>
    %cst_78 = arith.constant 2.500000e-01 : f32
    %225 = vector.broadcast %cst_78 : f32 to vector<8x8xf32>
    %226 = arith.mulf %224, %225 : vector<8x8xf32>
    %cst_79 = arith.constant dense<0xFF800000> : vector<8xf32>
    %227 = vector.multi_reduction <maximumf>, %226, %cst_79 [1] : vector<8x8xf32> to vector<8xf32>
    %228 = vector.shape_cast %227 : vector<8xf32> to vector<8x1xf32>
    %229 = vector.broadcast %228 : vector<8x1xf32> to vector<8x8xf32>
    %230 = arith.subf %226, %229 : vector<8x8xf32>
    %231 = math.exp %230 : vector<8x8xf32>
    %cst_80 = arith.constant dense<0.000000e+00> : vector<8xf32>
    %232 = vector.multi_reduction <add>, %231, %cst_80 [1] : vector<8x8xf32> to vector<8xf32>
    %233 = vector.shape_cast %232 : vector<8xf32> to vector<8x1xf32>
    %234 = tpu.reciprocal %233 {approx = true} : vector<8x1xf32> -> vector<8x1xf32>
    %235 = vector.broadcast %234 : vector<8x1xf32> to vector<8x8xf32>
    %236 = arith.mulf %231, %235 : vector<8x8xf32>
    %237 = arith.truncf %236 : vector<8x8xf32> to vector<8x8xbf16>
    %cst_81 = arith.constant dense<0.000000e+00> : vector<8x16xf32>
    %238 = tpu.matmul %237, %223, %cst_81 {dimension_numbers = #tpu.dot_dimension_numbers<[1], [0], [0], [1], [0, 0, 1, 1], [], []>} : vector<8x8xbf16>, vector<8x16xbf16>, vector<8x16xf32> -> vector<8x16xf32>
    %c0_82 = arith.constant 0 : index
    %c0_83 = arith.constant 0 : index
    %239 = vector.load %arg5[%c0_82, %c0_83] : memref<16x32xf32, #tpu.memory_space<vmem>>, vector<8x16xf32>
    tpu.vector_store %arg5[%c0_82, %c0_83], %238 {strides = array<i32>} : memref<16x32xf32, #tpu.memory_space<vmem>>, vector<8x16xf32>,
    %240 = vector.extract_strided_slice %215 {offsets = [0, 16], sizes = [8, 16], strides = [1, 1]} : vector<16x32xf32> to vector<8x16xf32>
    %241 = arith.truncf %240 : vector<8x16xf32> to vector<8x16xbf16>
    %242 = vector.extract_strided_slice %216 {offsets = [0, 16], sizes = [8, 16], strides = [1, 1]} : vector<16x32xf32> to vector<8x16xf32>
    %243 = arith.truncf %242 : vector<8x16xf32> to vector<8x16xbf16>
    %244 = vector.extract_strided_slice %217 {offsets = [0, 16], sizes = [8, 16], strides = [1, 1]} : vector<16x32xf32> to vector<8x16xf32>
    %245 = arith.truncf %244 : vector<8x16xf32> to vector<8x16xbf16>
    %cst_84 = arith.constant dense<0.000000e+00> : vector<8x8xf32>
    %246 = tpu.matmul %241, %243, %cst_84 {dimension_numbers = #tpu.dot_dimension_numbers<[1], [1], [0], [0], [0, 0, 1, 0], [], []>} : vector<8x16xbf16>, vector<8x16xbf16>, vector<8x8xf32> -> vector<8x8xf32>
    %cst_85 = arith.constant 2.500000e-01 : f32
    %247 = vector.broadcast %cst_85 : f32 to vector<8x8xf32>
    %248 = arith.mulf %246, %247 : vector<8x8xf32>
    %cst_86 = arith.constant dense<0xFF800000> : vector<8xf32>
    %249 = vector.multi_reduction <maximumf>, %248, %cst_86 [1] : vector<8x8xf32> to vector<8xf32>
    %250 = vector.shape_cast %249 : vector<8xf32> to vector<8x1xf32>
    %251 = vector.broadcast %250 : vector<8x1xf32> to vector<8x8xf32>
    %252 = arith.subf %248, %251 : vector<8x8xf32>
    %253 = math.exp %252 : vector<8x8xf32>
    %cst_87 = arith.constant dense<0.000000e+00> : vector<8xf32>
    %254 = vector.multi_reduction <add>, %253, %cst_87 [1] : vector<8x8xf32> to vector<8xf32>
    %255 = vector.shape_cast %254 : vector<8xf32> to vector<8x1xf32>
    %256 = tpu.reciprocal %255 {approx = true} : vector<8x1xf32> -> vector<8x1xf32>
    %257 = vector.broadcast %256 : vector<8x1xf32> to vector<8x8xf32>
    %258 = arith.mulf %253, %257 : vector<8x8xf32>
    %259 = arith.truncf %258 : vector<8x8xf32> to vector<8x8xbf16>
    %cst_88 = arith.constant dense<0.000000e+00> : vector<8x16xf32>
    %260 = tpu.matmul %259, %245, %cst_88 {dimension_numbers = #tpu.dot_dimension_numbers<[1], [0], [0], [1], [0, 0, 1, 1], [], []>} : vector<8x8xbf16>, vector<8x16xbf16>, vector<8x16xf32> -> vector<8x16xf32>
    %c0_89 = arith.constant 0 : index
    %c16_90 = arith.constant 16 : index
    %261 = vector.load %arg5[%c0_89, %c16_90] : memref<16x32xf32, #tpu.memory_space<vmem>>, vector<8x16xf32>
    tpu.vector_store %arg5[%c0_89, %c16_90], %260 {strides = array<i32>} : memref<16x32xf32, #tpu.memory_space<vmem>>, vector<8x16xf32>,
    %262 = vector.extract_strided_slice %215 {offsets = [8, 0], sizes = [8, 16], strides = [1, 1]} : vector<16x32xf32> to vector<8x16xf32>
    %263 = arith.truncf %262 : vector<8x16xf32> to vector<8x16xbf16>
    %264 = vector.extract_strided_slice %216 {offsets = [8, 0], sizes = [8, 16], strides = [1, 1]} : vector<16x32xf32> to vector<8x16xf32>
    %265 = arith.truncf %264 : vector<8x16xf32> to vector<8x16xbf16>
    %266 = vector.extract_strided_slice %217 {offsets = [8, 0], sizes = [8, 16], strides = [1, 1]} : vector<16x32xf32> to vector<8x16xf32>
    %267 = arith.truncf %266 : vector<8x16xf32> to vector<8x16xbf16>
    %cst_91 = arith.constant dense<0.000000e+00> : vector<8x8xf32>
    %268 = tpu.matmul %263, %265, %cst_91 {dimension_numbers = #tpu.dot_dimension_numbers<[1], [1], [0], [0], [0, 0, 1, 0], [], []>} : vector<8x16xbf16>, vector<8x16xbf16>, vector<8x8xf32> -> vector<8x8xf32>
    %cst_92 = arith.constant 2.500000e-01 : f32
    %269 = vector.broadcast %cst_92 : f32 to vector<8x8xf32>
    %270 = arith.mulf %268, %269 : vector<8x8xf32>
    %cst_93 = arith.constant dense<0xFF800000> : vector<8xf32>
    %271 = vector.multi_reduction <maximumf>, %270, %cst_93 [1] : vector<8x8xf32> to vector<8xf32>
    %272 = vector.shape_cast %271 : vector<8xf32> to vector<8x1xf32>
    %273 = vector.broadcast %272 : vector<8x1xf32> to vector<8x8xf32>
    %274 = arith.subf %270, %273 : vector<8x8xf32>
    %275 = math.exp %274 : vector<8x8xf32>
    %cst_94 = arith.constant dense<0.000000e+00> : vector<8xf32>
    %276 = vector.multi_reduction <add>, %275, %cst_94 [1] : vector<8x8xf32> to vector<8xf32>
    %277 = vector.shape_cast %276 : vector<8xf32> to vector<8x1xf32>
    %278 = tpu.reciprocal %277 {approx = true} : vector<8x1xf32> -> vector<8x1xf32>
    %279 = vector.broadcast %278 : vector<8x1xf32> to vector<8x8xf32>
    %280 = arith.mulf %275, %279 : vector<8x8xf32>
    %281 = arith.truncf %280 : vector<8x8xf32> to vector<8x8xbf16>
    %cst_95 = arith.constant dense<0.000000e+00> : vector<8x16xf32>
    %282 = tpu.matmul %281, %267, %cst_95 {dimension_numbers = #tpu.dot_dimension_numbers<[1], [0], [0], [1], [0, 0, 1, 1], [], []>} : vector<8x8xbf16>, vector<8x16xbf16>, vector<8x16xf32> -> vector<8x16xf32>
    %c8_96 = arith.constant 8 : index
    %c0_97 = arith.constant 0 : index
    %283 = vector.load %arg5[%c8_96, %c0_97] : memref<16x32xf32, #tpu.memory_space<vmem>>, vector<8x16xf32>
    tpu.vector_store %arg5[%c8_96, %c0_97], %282 {strides = array<i32>} : memref<16x32xf32, #tpu.memory_space<vmem>>, vector<8x16xf32>,
    %284 = vector.extract_strided_slice %215 {offsets = [8, 16], sizes = [8, 16], strides = [1, 1]} : vector<16x32xf32> to vector<8x16xf32>
    %285 = arith.truncf %284 : vector<8x16xf32> to vector<8x16xbf16>
    %286 = vector.extract_strided_slice %216 {offsets = [8, 16], sizes = [8, 16], strides = [1, 1]} : vector<16x32xf32> to vector<8x16xf32>
    %287 = arith.truncf %286 : vector<8x16xf32> to vector<8x16xbf16>
    %288 = vector.extract_strided_slice %217 {offsets = [8, 16], sizes = [8, 16], strides = [1, 1]} : vector<16x32xf32> to vector<8x16xf32>
    %289 = arith.truncf %288 : vector<8x16xf32> to vector<8x16xbf16>
    %cst_98 = arith.constant dense<0.000000e+00> : vector<8x8xf32>
    %290 = tpu.matmul %285, %287, %cst_98 {dimension_numbers = #tpu.dot_dimension_numbers<[1], [1], [0], [0], [0, 0, 1, 0], [], []>} : vector<8x16xbf16>, vector<8x16xbf16>, vector<8x8xf32> -> vector<8x8xf32>
    %cst_99 = arith.constant 2.500000e-01 : f32
    %291 = vector.broadcast %cst_99 : f32 to vector<8x8xf32>
    %292 = arith.mulf %290, %291 : vector<8x8xf32>
    %cst_100 = arith.constant dense<0xFF800000> : vector<8xf32>
    %293 = vector.multi_reduction <maximumf>, %292, %cst_100 [1] : vector<8x8xf32> to vector<8xf32>
    %294 = vector.shape_cast %293 : vector<8xf32> to vector<8x1xf32>
    %295 = vector.broadcast %294 : vector<8x1xf32> to vector<8x8xf32>
    %296 = arith.subf %292, %295 : vector<8x8xf32>
    %297 = math.exp %296 : vector<8x8xf32>
    %cst_101 = arith.constant dense<0.000000e+00> : vector<8xf32>
    %298 = vector.multi_reduction <add>, %297, %cst_101 [1] : vector<8x8xf32> to vector<8xf32>
    %299 = vector.shape_cast %298 : vector<8xf32> to vector<8x1xf32>
    %300 = tpu.reciprocal %299 {approx = true} : vector<8x1xf32> -> vector<8x1xf32>
    %301 = vector.broadcast %300 : vector<8x1xf32> to vector<8x8xf32>
    %302 = arith.mulf %297, %301 : vector<8x8xf32>
    %303 = arith.truncf %302 : vector<8x8xf32> to vector<8x8xbf16>
    %cst_102 = arith.constant dense<0.000000e+00> : vector<8x16xf32>
    %304 = tpu.matmul %303, %289, %cst_102 {dimension_numbers = #tpu.dot_dimension_numbers<[1], [0], [0], [1], [0, 0, 1, 1], [], []>} : vector<8x8xbf16>, vector<8x16xbf16>, vector<8x16xf32> -> vector<8x16xf32>
    %c8_103 = arith.constant 8 : index
    %c16_104 = arith.constant 16 : index
    %305 = vector.load %arg5[%c8_103, %c16_104] : memref<16x32xf32, #tpu.memory_space<vmem>>, vector<8x16xf32>
    tpu.vector_store %arg5[%c8_103, %c16_104], %304 {strides = array<i32>} : memref<16x32xf32, #tpu.memory_space<vmem>>, vector<8x16xf32>,
    %c0_105 = arith.constant 0 : index
    %c0_106 = arith.constant 0 : index
    %306 = vector.load %arg5[%c0_105, %c0_106] : memref<16x32xf32, #tpu.memory_space<vmem>>, vector<16x32xf32>
    %307 = arith.truncf %306 : vector<16x32xf32> to vector<16x32xbf16>
    %cst_107 = arith.constant dense<0.000000e+00> : vector<16x32xf32>
    %308 = tpu.matmul %307, %198, %cst_107 {dimension_numbers = #tpu.dot_dimension_numbers<[1], [0], [0], [1], [0, 0, 1, 1], [], []>} : vector<16x32xbf16>, vector<32x32xbf16>, vector<16x32xf32> -> vector<16x32xf32>
    %309 = vector.broadcast %204 : vector<1x32xf32> to vector<16x32xf32>
    %310 = arith.addf %308, %309 : vector<16x32xf32>
    %311 = arith.addf %194, %310 : vector<16x32xf32>
    %cst_108 = arith.constant dense<0.000000e+00> : vector<16xf32>
    %312 = vector.multi_reduction <add>, %311, %cst_108 [1] : vector<16x32xf32> to vector<16xf32>
    %313 = vector.shape_cast %312 : vector<16xf32> to vector<16x1xf32>
    %cst_109 = arith.constant 3.200000e+01 : f32
    %314 = vector.broadcast %cst_109 : f32 to vector<16x1xf32>
    %315 = arith.divf %313, %314 : vector<16x1xf32>
    %316 = vector.broadcast %315 : vector<16x1xf32> to vector<16x32xf32>
    %317 = arith.subf %311, %316 : vector<16x32xf32>
    %318 = arith.mulf %317, %317 : vector<16x32xf32>
    %cst_110 = arith.constant dense<0.000000e+00> : vector<16xf32>
    %319 = vector.multi_reduction <add>, %318, %cst_110 [1] : vector<16x32xf32> to vector<16xf32>
    %320 = vector.shape_cast %319 : vector<16xf32> to vector<16x1xf32>
    %cst_111 = arith.constant 3.200000e+01 : f32
    %321 = vector.broadcast %cst_111 : f32 to vector<16x1xf32>
    %322 = arith.divf %320, %321 : vector<16x1xf32>
    %cst_112 = arith.constant 9.99999974E-6 : f32
    %323 = vector.broadcast %cst_112 : f32 to vector<16x1xf32>
    %324 = arith.addf %322, %323 : vector<16x1xf32>
    %325 = math.rsqrt %324 : vector<16x1xf32>
    %326 = vector.broadcast %325 : vector<16x1xf32> to vector<16x32xf32>
    %327 = arith.mulf %317, %326 : vector<16x32xf32>
    %328 = vector.broadcast %207 : vector<1x32xf32> to vector<16x32xf32>
    %329 = arith.mulf %327, %328 : vector<16x32xf32>
    %330 = vector.broadcast %208 : vector<1x32xf32> to vector<16x32xf32>
    %331 = arith.addf %329, %330 : vector<16x32xf32>
    %332 = arith.truncf %331 : vector<16x32xf32> to vector<16x32xbf16>
    %cst_113 = arith.constant dense<0.000000e+00> : vector<16x64xf32>
    %333 = tpu.matmul %332, %200, %cst_113 {dimension_numbers = #tpu.dot_dimension_numbers<[1], [0], [0], [1], [0, 0, 1, 1], [], []>} : vector<16x32xbf16>, vector<32x64xbf16>, vector<16x64xf32> -> vector<16x64xf32>
    %334 = vector.broadcast %205 : vector<1x64xf32> to vector<16x64xf32>
    %335 = arith.addf %333, %334 : vector<16x64xf32>
    %cst_114 = arith.constant 5.000000e-01 : f32
    %336 = vector.broadcast %cst_114 : f32 to vector<16x64xf32>
    %337 = arith.mulf %336, %335 : vector<16x64xf32>
    %cst_115 = arith.constant 4.471500e-02 : f32
    %338 = vector.broadcast %cst_115 : f32 to vector<16x64xf32>
    %339 = arith.mulf %338, %335 : vector<16x64xf32>
    %340 = arith.mulf %339, %335 : vector<16x64xf32>
    %341 = arith.mulf %340, %335 : vector<16x64xf32>
    %342 = arith.addf %335, %341 : vector<16x64xf32>
    %cst_116 = arith.constant 0.797884583 : f32
    %343 = vector.broadcast %cst_116 : f32 to vector<16x64xf32>
    %344 = arith.mulf %343, %342 : vector<16x64xf32>
    %345 = math.tanh %344 : vector<16x64xf32>
    %cst_117 = arith.constant 1.000000e+00 : f32
    %346 = vector.broadcast %cst_117 : f32 to vector<16x64xf32>
    %347 = arith.addf %346, %345 : vector<16x64xf32>
    %348 = arith.mulf %337, %347 : vector<16x64xf32>
    %349 = arith.truncf %348 : vector<16x64xf32> to vector<16x64xbf16>
    %cst_118 = arith.constant dense<0.000000e+00> : vector<16x32xf32>
    %350 = tpu.matmul %349, %202, %cst_118 {dimension_numbers = #tpu.dot_dimension_numbers<[1], [0], [0], [1], [0, 0, 1, 1], [], []>} : vector<16x64xbf16>, vector<64x32xbf16>, vector<16x32xf32> -> vector<16x32xf32>
    %351 = vector.broadcast %206 : vector<1x32xf32> to vector<16x32xf32>
    %352 = arith.addf %350, %351 : vector<16x32xf32>
    %353 = arith.addf %331, %352 : vector<16x32xf32>
    %cst_119 = arith.constant dense<0.000000e+00> : vector<16xf32>
    %354 = vector.multi_reduction <add>, %353, %cst_119 [1] : vector<16x32xf32> to vector<16xf32>
    %355 = vector.shape_cast %354 : vector<16xf32> to vector<16x1xf32>
    %cst_120 = arith.constant 3.200000e+01 : f32
    %356 = vector.broadcast %cst_120 : f32 to vector<16x1xf32>
    %357 = arith.divf %355, %356 : vector<16x1xf32>
    %358 = vector.broadcast %357 : vector<16x1xf32> to vector<16x32xf32>
    %359 = arith.subf %353, %358 : vector<16x32xf32>
    %360 = arith.mulf %359, %359 : vector<16x32xf32>
    %cst_121 = arith.constant dense<0.000000e+00> : vector<16xf32>
    %361 = vector.multi_reduction <add>, %360, %cst_121 [1] : vector<16x32xf32> to vector<16xf32>
    %362 = vector.shape_cast %361 : vector<16xf32> to vector<16x1xf32>
    %cst_122 = arith.constant 3.200000e+01 : f32
    %363 = vector.broadcast %cst_122 : f32 to vector<16x1xf32>
    %364 = arith.divf %362, %363 : vector<16x1xf32>
    %cst_123 = arith.constant 9.99999974E-6 : f32
    %365 = vector.broadcast %cst_123 : f32 to vector<16x1xf32>
    %366 = arith.addf %364, %365 : vector<16x1xf32>
    %367 = math.rsqrt %366 : vector<16x1xf32>
    %368 = vector.broadcast %367 : vector<16x1xf32> to vector<16x32xf32>
    %369 = arith.mulf %359, %368 : vector<16x32xf32>
    %370 = vector.broadcast %209 : vector<1x32xf32> to vector<16x32xf32>
    %371 = arith.mulf %369, %370 : vector<16x32xf32>
    %372 = vector.broadcast %210 : vector<1x32xf32> to vector<16x32xf32>
    %373 = arith.addf %371, %372 : vector<16x32xf32>
    %c0_124 = arith.constant 0 : index
    %c0_125 = arith.constant 0 : index
    %374 = vector.load %arg4[%c0_124, %c0_125] : memref<16x32xf32, #tpu.memory_space<vmem>>, vector<16x32xf32>
    tpu.vector_store %arg4[%c0_124, %c0_125], %373 {strides = array<i32>} : memref<16x32xf32, #tpu.memory_space<vmem>>, vector<16x32xf32>,
    return
  }
  func.func @transform_0(%arg0: i32) -> (i32, i32) {
    %c0_i32 = arith.constant 0 : i32
    %c0_i32_0 = arith.constant 0 : i32
    %c0_i32_1 = arith.constant 0 : i32
    return %c0_i32, %c0_i32_0 : i32, i32
  }
  func.func @transform_1(%arg0: i32) -> (i32, i32) {
    %c0_i32 = arith.constant 0 : i32
    %c0_i32_0 = arith.constant 0 : i32
    %c0_i32_1 = arith.constant 0 : i32
    return %c0_i32, %c0_i32_0 : i32, i32
  }
  func.func @transform_2(%arg0: i32) -> (i32, i32) {
    %c0_i32 = arith.constant 0 : i32
    %c0_i32_0 = arith.constant 0 : i32
    %c0_i32_1 = arith.constant 0 : i32
    return %c0_i32, %c0_i32_0 : i32, i32
  }
  func.func @transform_3(%arg0: i32) -> (i32, i32) {
    %c0_i32 = arith.constant 0 : i32
    %c0_i32_0 = arith.constant 0 : i32
    %c0_i32_1 = arith.constant 0 : i32
    return %c0_i32, %c0_i32_0 : i32, i32
  }
}

</mosaic_0001>

<bundles_post_ra>
// kernel: model_forward.1
= control target key start
LH: loop header
LB: loop body
LE: loop exit
PB: predicated region body
PF: predicated region fallthrough
CT: control target
= control target key end

     0   :  { %8 = vsyncpa [#allocation4], 0  ;;  %s2440_s0 = inlined_call_operand.vmem [shape: s32[16,1], index: 0, kind: input, shape index: {}]   ;;  %s2441_s1 = inlined_call_operand.vmem [shape: f32[64,32], index: 1, kind: input, shape index: {}]   ;;  %s2442_s2 = inlined_call_operand.hbm [shape: f32[344,128], index: 2, kind: input, shape index: {}]   ;;  %s2443_s3 = inlined_call_operand.hbm [shape: f32[16,32], index: 3, kind: output, shape index: {}]  }
   0x1   :  { %9 = vsyncpa [#allocation5], 0  ;;  %s2114_s12 = smov [#allocation3]  }
   0x2   :  { %s19_s13 = sshll.u32 %s2114_s12, 4  ;;  %s20_s13 = int_to_ptr.vmem [resolvable:$true] %s19_s13 }
   0x3   :  { %s2078_s14 = scalar_lea.vmem %s20_s13, 5504  ;;  %p2083_p1 = scmp.lt.s32.totalorder %s20_s13, %s20_s13 }
   0x4   :  { %p2079_p0 = scmp.ne.s32.totalorder %s20_s13, %s2078_s14  ;;  %p2084_p2 = scmp.lt.s32.totalorder %s2078_s14, %s2078_s14 }
   0x6   :  { %p2085_p3 = por %p2084_p2, %p2083_p1 }
   0x8   :  { %p2086_p4 = pnand %p2085_p3, %p2079_p0 }
   0xa   :  { %2089 = shalt.err (!%p2086_p4)
}
   0xb   :  { %s2115_s15 = smov 128   ;;  %s2116_s16 = smov 8  }
   0xc   :  { %25 = dma.hbm_to_vmem [thread:$0]  %s2442_s2, 5504, %s20_s13, [#allocation4], %s2115_s15, %s2115_s15, %s2116_s16  }
   0xd   :  { %2110 = dma.done.wait [#allocation4], 5504  }
   0xe   :  { %2111 = vsyncadd [#allocation4], 4294961792  ;;  %v2117_v0 = vmov 0   ;;  %v2118_v1 = vmov 0.0   ;;  %v30_v2 = vld [vmem:[%s2440_s0] sm:$0xff]  ;;  %v53_v3 = vld [vmem:[%s2441_s1 + $0x30] sm:$0xff]  ;;  %v32_v16 = vlaneseq }
   0xf   :  { %2013 = vset.pattern.permute.xlu0 %v2117_v0  ;;  %1820 = vmatprep.subr.bf16.mxu0 %v2118_v1  ;;  %v54_v4 = vld [vmem:[%s2441_s1 + $0x38] sm:$0xff]  ;;  %v51_v5 = vld [vmem:[%s2441_s1 + $0x20] sm:$0xff]  ;;  %v52_v6 = vld [vmem:[%s2441_s1 + $0x28] sm:$0xff]  ;;  %vm2119_vm0 = vmmov 0   ;;  %vm59_vm3 = vcmask 523264   ;;  %vm150_vm4 = vcmask 261120  }
  0x10   :  { %1832 = vmatprep.subr.bf16.mxu1 %v2118_v1  ;;  %35 = vperm.xlu0 %2013, %v30_v2   ;;  %v31_v7 = vld [vmem:[%s2440_s0 + $0x8] sm:$0xff]  ;;  %v58_v8 = vpack.c.bf16 %v54_v4, %v53_v3  ;;  %v57_v9 = vpack.c.bf16 %v52_v6, %v51_v5  ;;  %v49_v10 = vld [vmem:[%s2441_s1 + $0x10] sm:$0xff]  ;;  %v50_v11 = vld [vmem:[%s2441_s1 + $0x18] sm:$0xff]  ;;  %v33_v17 = vand.u32 127, %v32_v16  ;;  %vm199_vm5 = vcmask 130048   ;;  %s2121_s10 = smov 80  }
  0x11   :  { %1828 = vmatprep.mubr.msk.bf16.mxu0 %vm2119_vm0, %v2118_v1  ;;  %1836 = vmatprep.mubr.msk.bf16.mxu1 %vm2119_vm0, %v2118_v1  ;;  %v56_v12 = vpack.c.bf16 %v50_v11, %v49_v10  ;;  %v47_v13 = vld [vmem:[%s2441_s1] sm:$0xff]  ;;  %v48_v14 = vld [vmem:[%s2441_s1 + $0x8] sm:$0xff]  ;;  %v110_v24 = vld [vmem:[#allocation3 + $0x20] sm:$0xff]  ;;  %s2120_s1 = smov 96   ;;  %vm247_vm6 = vcmask 64512   ;;  %s2122_s11 = smov 112  }
  0x12   :  { %1821 = vmatpush3.bf16.msra.mxu0 %v58_v8  ;;  %v55_v15 = vpack.c.bf16 %v48_v14, %v47_v13  ;;  %v109_v23 = vld [vmem:[#allocation3 + $0x18] sm:$0xff]  ;;  %v107_v26 = vld [vmem:[#allocation3 + $0x8] sm:$0xff]  ;;  %v108_v27 = vld [vmem:[#allocation3 + $0x10] sm:$0xff]  ;;  %s2123_s12 = smov 64   ;;  %vm265_vm7 = vcmask 1043456   ;;  %s2124_s13 = smov 48  }
  0x13   :  { %1822 = vmatprep.subr.bf16.mxu0 %v2118_v1  ;;  %v112_v25 = vpack.c.bf16 %v110_v24, %v109_v23  ;;  %v111_v28 = vpack.c.bf16 %v108_v27, %v107_v26  ;;  %v104_v30 = vld [vmem:[#allocation3] sm:$0xff]  ;;  %v1715_v37 = vld [vmem:[#allocation3 + $0xa8] ss:$0 sm:$0xff]  ;;  %s2125_s14 = smov 16   ;;  %vm425_vm8 = vcmask 261248   ;;  %s2126_s17 = smov [#allocation6]  }
  0x14   :  { %38 = vperm.xlu0 %2013, %v31_v7   ;;  %s1700_s18 = sshll.u32 %s2126_s17, 4  ;;  %s1701_s18 = int_to_ptr.vmem [resolvable:$true] %s1700_s18 }
  0x15   :  { %1833 = vmatpush3.bf16.msra.mxu1 %v112_v25  ;;  %s2090_s19 = scalar_lea.vmem %s1701_s18, 256  ;;  %p2095_p6 = scmp.lt.s32.totalorder %s1701_s18, %s1701_s18 }
  0x16   :  { %1823 = vmatpush3.bf16.msra.mxu0 %v57_v9  ;;  %1834 = vmatprep.subr.bf16.mxu1 %v2118_v1  ;;  %p2091_p5 = scmp.ne.s32.totalorder %s1701_s18, %s2090_s19  ;;  %p2096_p7 = scmp.lt.s32.totalorder %s2090_s19, %s2090_s19 }
  0x17   :  { %1824 = vmatprep.subr.bf16.mxu0 %v2118_v1 }
  0x18   :  { %p2097_p8 = por %p2096_p7, %p2095_p6 }
  0x19   :  { %1835 = vmatpush3.bf16.msra.mxu1 %v111_v28 }
  0x1a   :  { %1825 = vmatpush3.bf16.msra.mxu0 %v56_v12  ;;  %1840 = vmatprep.subr.bf16.mxu1 %v2118_v1  ;;  %p2098_p9 = pnand %p2097_p8, %p2091_p5 }
  0x1b   :  { %1826 = vmatprep.subr.bf16.mxu0 %v2118_v1 }
  0x1e   :  { %1827 = vmatpush3.bf16.msra.mxu0 %v55_v15 }
  0x1f   :  { %1858 = vmatprep.subr.bf16.mxu0 %v2118_v1 }
  0x8b   :  { %v36_v18 = vpop.permute.xlu0 %35 }
  0x8c   :  { %vm40_vm1 = vcmp.eq.s32.totalorder %v33_v17, %v36_v18 }
  0x8d   :  { %v1712_v20 = vsel %vm40_vm1, 1.0, %v2118_v1 }
  0x8f   :  { %v39_v19 = vpop.permute.xlu0 %38 }
  0x90   :  { %vm41_vm2 = vcmp.eq.s32.totalorder %v33_v17, %v39_v19 }
  0x91   :  { %v1713_v21 = vsel %vm41_vm2, 1.0, %v2118_v1 }
  0x92   :  { %v46_v22 = vpack.c.bf16 %v1713_v21, %v1712_v20 }
  0x94   :  { %1829 = vmatmul.mubr.msk.bf16.vlgmr.msra.gmra.mxu0 %vm59_vm3, %v46_v22 }
  0x95   :  { %1860 = vmatprep.mubr.msk.bf16.mxu0 %vm2119_vm0, %v2118_v1 }
 0x154   :  { %v97_v29 = vpop.f32.mrf.mxu0 }
 0x155   :  { %v2200_v33 = vadd.f32 %v104_v30, %v97_v29 }
 0x156   :  { %v1830_v31 = vpop.f32.mrf.mxu0 }
 0x158   :  { %v100_v32 = vpop.f32.mrf.mxu0 }
 0x159   :  { %v2202_v34 = vadd.f32 %v104_v30, %v100_v32 }
 0x15a   :  { %v1831_v35 = vpop.f32.mrf.mxu0 }
 0x15b   :  { %v145_v36 = vpack.c.bf16 %v2202_v34, %v2200_v33 }
 0x15d   :  { %1837 = vmatmul.mubr.msk.bf16.vlgmr.msra.gmra.mxu1 %vm150_vm4, %v145_v36 }
 0x15e   :  { %1842 = vmatprep.mubr.msk.bf16.mxu1 %vm2119_vm0, %v2118_v1 }
 0x21d   :  { %v188_v38 = vpop.f32.mrf.mxu1 }
 0x21e   :  { %v189_v39 = vadd.f32 %v1715_v37, %v188_v38 }
 0x21f   :  { %v1838_v40 = vpop.f32.mrf.mxu1 }
 0x220   :  { %v2209_v41 = vpack.c.bf16 %v189_v39, %v189_v39 }
 0x221   :  { %v191_v42 = vpop.f32.mrf.mxu1 }
 0x222   :  { %v192_v43 = vadd.f32 %v1715_v37, %v191_v42  ;;  %197 = vrot.lane.b32.xlu1 %v2209_v41, %s2120_s1 }
 0x223   :  { %v1839_v44 = vpop.f32.mrf.mxu1 }
 0x224   :  { %v2224_v53 = vpack.c.bf16 %v192_v43, %v192_v43 }
 0x294   :  { %v198_v45 = vpop.permute.xlu1 %197 }
 0x295   :  { %v204_v46 = vsel %vm199_vm5, %v198_v45, 0 }
 0x296   :  { %1841 = vmatpush3.bf16.xpose.msra.mxu1 %v204_v46 }
 0x297   :  { %1846 = vmatprep.subr.bf16.mxu1 %v2118_v1 }
 0x29d   :  { %1843 = vmatmul.mubr.msk.bf16.vlgmr.msra.gmra.mxu1 %vm199_vm5, %v2209_v41 }
 0x29e   :  { %1848 = vmatprep.mubr.msk.bf16.mxu1 %vm2119_vm0, %v2118_v1 }
 0x35d   :  { %v240_v47 = vpop.f32.mrf.mxu1 }
 0x35e   :  { %v246_v48 = vmul.f32 0.25, %v240_v47 }
 0x35f   :  { %v1844_v49 = vpop.f32.mrf.mxu1 }
 0x360   :  { %v248_v50 = vsel %vm247_vm6, %v246_v48, -inf }
 0x361   :  { %249 = vmax.xlane.f32.xlu1 %v248_v50  ;;  %v243_v51 = vpop.f32.mrf.mxu1 }
 0x363   :  { %v1845_v52 = vpop.f32.mrf.mxu1 }
 0x372   :  { %312 = vrot.lane.b32.xlu1 %v2209_v41, %s2121_s10 }
 0x376   :  { %310 = vrot.lane.b32.xlu1 %v2209_v41, %s2122_s11 }
 0x37a   :  { %541 = vrot.lane.b32.xlu1 %v2224_v53, %s2121_s10 }
 0x3ea   :  { %v250_v54 = vpop.xlane.xlu1 %249 }
 0x3eb   :  { %v251_v55 = vsub.f32 %v246_v48, %v250_v54 }
 0x3ed   :  { %v252_v56 = vmul.f32 1.442695, %v251_v55 }
 0x3ee   :  { %v313_v0 = vpop.permute.xlu1 %312 }
 0x3ef   :  { %2014 = vpow2.f32 %v252_v56  ;;  %v318_v3 = vsel %vm199_vm5, %v313_v0, 0 }
 0x3f2   :  { %v311_v5 = vpop.permute.xlu1 %310 }
 0x3f6   :  { %v542_v7 = vpop.permute.xlu1 %541 }
 0x3f7   :  { %v547_v8 = vsel %vm199_vm5, %v542_v7, 0 }
 0x3fc   :  { %v2015_v57 = vpop.eup %2014 }
 0x3fd   :  { %v254_v58 = vsel %vm247_vm6, %v2015_v57, 0.0 }
 0x3fe   :  { %255 = vadd.xlane.f32.xlu0 %v254_v58 }
 0x414   :  { %260 = vrot.lane.b32.xlu0 %v2209_v41, %s2123_s12 }
 0x418   :  { %429 = vrot.lane.b32.xlu0 %v2224_v53, %s2120_s1 }
 0x41c   :  { %539 = vrot.lane.b32.xlu0 %v2224_v53, %s2122_s11 }
 0x487   :  { %v256_v59 = vpop.xlane.xlu0 %255 }
 0x488   :  { %2016 = vrcp.f32 %v256_v59 }
 0x48b   :  { %v261_v60 = vpop.permute.xlu0 %260 }
 0x48c   :  { %v267_v61 = vsel %vm265_vm7, %v261_v60, 0 }
 0x48d   :  { %1847 = vmatpush3.bf16.msra.mxu1 %v267_v61 }
 0x48e   :  { %1852 = vmatprep.subr.bf16.mxu1 %v2118_v1 }
 0x48f   :  { %v430_v4 = vpop.permute.xlu0 %429 }
 0x490   :  { %v435_v6 = vsel %vm199_vm5, %v430_v4, 0 }
 0x493   :  { %v540_v9 = vpop.permute.xlu0 %539 }
 0x495   :  { %v2017_v62 = vpop.eup %2016 }
 0x496   :  { %v258_v63 = vmul.f32 %v2017_v62, %v2015_v57 }
 0x498   :  { %v259_v2 = vpack.c.bf16 %v258_v63, %v258_v63 }
 0x49a   :  { %1849 = vmatmul.mubr.msk.bf16.vlgmr.msra.gmra.mxu1 %vm247_vm6, %v259_v2 }
 0x49b   :  { %1853 = vmatpush3.bf16.xpose.msra.mxu1 %v318_v3  ;;  %1854 = vmatprep.mubr.msk.bf16.mxu1 %vm2119_vm0, %v2118_v1 }
 0x49c   :  { %1864 = vmatprep.subr.bf16.mxu1 %v2118_v1 }
 0x4a2   :  { %1855 = vmatmul.mubr.msk.bf16.vlgmr.msra.gmra.mxu1 %vm199_vm5, %v311_v5 }
 0x4a3   :  { %1865 = vmatpush3.bf16.xpose.msra.mxu1 %v435_v6  ;;  %1866 = vmatprep.mubr.msk.bf16.mxu1 %vm2119_vm0, %v2118_v1 }
 0x4a4   :  { %1876 = vmatprep.subr.bf16.mxu1 %v2118_v1 }
 0x4aa   :  { %1867 = vmatmul.mubr.msk.bf16.vlgmr.msra.gmra.mxu1 %vm199_vm5, %v2224_v53 }
 0x4ab   :  { %1877 = vmatpush3.bf16.xpose.msra.mxu1 %v547_v8  ;;  %1878 = vmatprep.mubr.msk.bf16.mxu1 %vm2119_vm0, %v2118_v1 }
 0x4ac   :  { %1888 = vmatprep.subr.bf16.mxu1 %v2118_v1 }
 0x4b2   :  { %1879 = vmatmul.mubr.msk.bf16.vlgmr.msra.gmra.mxu1 %vm199_vm5, %v540_v9 }
 0x4b3   :  { %1892 = vmatprep.mubr.msk.bf16.mxu1 %vm2119_vm0, %v2118_v1 }
 0x55a   :  { %v303_v10 = vpop.f32.mrf.mxu1 }
 0x55b   :  { %309 = vst.msk [vmem:[#allocation2] sm:$0xff] %vm199_vm5, %v303_v10 }
 0x55c   :  { %v1850_v11 = vpop.f32.mrf.mxu1 }
 0x55e   :  { %v306_v12 = vpop.f32.mrf.mxu1 }
 0x55f   :  { %v115_v12 = vld [vmem:[#allocation3 + $0x38] sm:$0xff] }
 0x560   :  { %v1851_v13 = vpop.f32.mrf.mxu1 }
 0x561   :  { %v116_v13 = vld [vmem:[#allocation3 + $0x40] sm:$0xff] }
 0x562   :  { %v354_v14 = vpop.f32.mrf.mxu1 }
 0x563   :  { %v360_v15 = vmul.f32 0.25, %v354_v14  ;;  %v113_v14 = vld [vmem:[#allocation3 + $0x28] sm:$0xff] }
 0x564   :  { %v1856_v16 = vpop.f32.mrf.mxu1 }
 0x565   :  { %v361_v17 = vsel %vm247_vm6, %v360_v15, -inf  ;;  %v114_v16 = vld [vmem:[#allocation3 + $0x30] sm:$0xff] }
 0x566   :  { %362 = vmax.xlane.f32.xlu1 %v361_v17  ;;  %v357_v18 = vpop.f32.mrf.mxu1  ;;  %v117_v17 = vpack.c.bf16 %v114_v16, %v113_v14  ;;  %v127_v14 = vld [vmem:[#allocation3 + $0x78] sm:$0xff] }
 0x568   :  { %v1857_v19 = vpop.f32.mrf.mxu1 }
 0x56a   :  { %v471_v20 = vpop.f32.mrf.mxu1 }
 0x56b   :  { %v477_v21 = vmul.f32 0.25, %v471_v20 }
 0x56c   :  { %v1868_v22 = vpop.f32.mrf.mxu1 }
 0x56d   :  { %v478_v23 = vsel %vm247_vm6, %v477_v21, -inf }
 0x56e   :  { %479 = vmax.xlane.f32.xlu0 %v478_v23  ;;  %v474_v24 = vpop.f32.mrf.mxu1 }
 0x570   :  { %v1869_v25 = vpop.f32.mrf.mxu1 }
 0x572   :  { %v583_v26 = vpop.f32.mrf.mxu1 }
 0x573   :  { %v589_v27 = vmul.f32 0.25, %v583_v26 }
 0x574   :  { %v1880_v28 = vpop.f32.mrf.mxu1 }
 0x575   :  { %v590_v29 = vsel %vm247_vm6, %v589_v27, -inf }
 0x576   :  { %591 = vmax.xlane.f32.xlu0 %v590_v29  ;;  %v586_v30 = vpop.f32.mrf.mxu1 }
 0x578   :  { %v1881_v31 = vpop.f32.mrf.mxu1 }
 0x5ef   :  { %v363_v32 = vpop.xlane.xlu1 %362 }
 0x5f0   :  { %v364_v35 = vsub.f32 %v360_v15, %v363_v32  ;;  %v118_v15 = vpack.c.bf16 %v116_v13, %v115_v12  ;;  %v130_v12 = vld [vmem:[#allocation3 + $0x90] sm:$0xff] }
 0x5f2   :  { %v365_v36 = vmul.f32 1.442695, %v364_v35  ;;  %1889 = vmatpush3.bf16.msra.mxu1 %v118_v15  ;;  %v128_v15 = vld [vmem:[#allocation3 + $0x80] sm:$0xff] }
 0x5f3   :  { %1890 = vmatprep.subr.bf16.mxu1 %v2118_v1  ;;  %v134_v16 = vpack.c.bf16 %v128_v15, %v127_v14 }
 0x5f4   :  { %2018 = vpow2.f32 %v365_v36 }
 0x5f6   :  { %1891 = vmatpush3.bf16.msra.mxu1 %v117_v17  ;;  %v125_v17 = vld [vmem:[#allocation3 + $0x68] sm:$0xff] }
 0x5f7   :  { %v480_v37 = vpop.xlane.xlu0 %479  ;;  %1904 = vmatprep.subr.bf16.mxu1 %v2118_v1 }
 0x5f8   :  { %v481_v38 = vsub.f32 %v477_v21, %v480_v37 }
 0x5fa   :  { %v482_v39 = vmul.f32 1.442695, %v481_v38 }
 0x5fc   :  { %2020 = vpow2.f32 %v482_v39 }
 0x5ff   :  { %v592_v45 = vpop.xlane.xlu0 %591 }
 0x600   :  { %v593_v46 = vsub.f32 %v589_v27, %v592_v45  ;;  %v1725_v27 = vld [vmem:[#allocation3 + $0xa9] ss:$0 sm:$0xff] }
 0x601   :  { %v2019_v40 = vpop.eup %2018 }
 0x602   :  { %v367_v42 = vsel %vm247_vm6, %v2019_v40, 0.0  ;;  %v594_v47 = vmul.f32 1.442695, %v593_v46 }
 0x603   :  { %368 = vadd.xlane.f32.xlu1 %v367_v42 }
 0x604   :  { %2022 = vpow2.f32 %v594_v47 }
 0x609   :  { %v2021_v43 = vpop.eup %2020 }
 0x60a   :  { %v484_v44 = vsel %vm247_vm6, %v2021_v43, 0.0 }
 0x60b   :  { %485 = vadd.xlane.f32.xlu0 %v484_v44 }
 0x611   :  { %v2023_v48 = vpop.eup %2022 }
 0x612   :  { %v596_v49 = vsel %vm247_vm6, %v2023_v48, 0.0 }
 0x614   :  { %490 = vrot.lane.b32.xlu1 %v2224_v53, %s2123_s12 }
 0x621   :  { %373 = vrot.lane.b32.xlu0 %v2209_v41, %s2124_s13 }
 0x638   :  { %597 = vadd.xlane.f32.xlu1 %v596_v49 }
 0x649   :  { %602 = vrot.lane.b32.xlu1 %v2224_v53, %s2124_s13 }
 0x68c   :  { %v369_v50 = vpop.xlane.xlu1 %368 }
 0x68d   :  { %2024 = vrcp.f32 %v369_v50  ;;  %v121_v50 = vld [vmem:[#allocation3 + $0x58] sm:$0xff] }
 0x690   :  { %v491_v56 = vpop.permute.xlu1 %490 }
 0x691   :  { %v496_v58 = vsel %vm265_vm7, %v491_v56, 0 }
 0x694   :  { %v486_v51 = vpop.xlane.xlu0 %485 }
 0x695   :  { %2026 = vrcp.f32 %v486_v51  ;;  %v122_v51 = vld [vmem:[#allocation3 + $0x60] sm:$0xff] }
 0x698   :  { %v374_v52 = vpop.permute.xlu0 %373 }
 0x699   :  { %v379_v54 = vsel %vm265_vm7, %v374_v52, 0  ;;  %v119_v52 = vld [vmem:[#allocation3 + $0x48] sm:$0xff] }
 0x69a   :  { %v2025_v55 = vpop.eup %2024  ;;  %1859 = vmatpush3.bf16.msra.mxu0 %v379_v54  ;;  %v120_v54 = vld [vmem:[#allocation3 + $0x50] sm:$0xff] }
 0x69b   :  { %1870 = vmatprep.subr.bf16.mxu0 %v2118_v1  ;;  %v371_v41 = vmul.f32 %v2025_v55, %v2019_v40  ;;  %v123_v55 = vpack.c.bf16 %v120_v54, %v119_v52 }
 0x69d   :  { %v372_v57 = vpack.c.bf16 %v371_v41, %v371_v41 }
 0x69f   :  { %1861 = vmatmul.mubr.msk.bf16.vlgmr.msra.gmra.mxu0 %vm247_vm6, %v372_v57 }
 0x6a0   :  { %1871 = vmatpush3.bf16.msra.mxu0 %v496_v58  ;;  %1872 = vmatprep.mubr.msk.bf16.mxu0 %vm2119_vm0, %v2118_v1 }
 0x6a1   :  { %1882 = vmatprep.subr.bf16.mxu0 %v2118_v1 }
 0x6a2   :  { %v2027_v53 = vpop.eup %2026 }
 0x6a3   :  { %v488_v59 = vmul.f32 %v2027_v53, %v2021_v43 }
 0x6a5   :  { %v489_v60 = vpack.c.bf16 %v488_v59, %v488_v59 }
 0x6a7   :  { %1873 = vmatmul.mubr.msk.bf16.vlgmr.msra.gmra.mxu0 %vm247_vm6, %v489_v60 }
 0x6a8   :  { %1884 = vmatprep.mubr.msk.bf16.mxu0 %vm2119_vm0, %v2118_v1 }
 0x6c1   :  { %v598_v61 = vpop.xlane.xlu1 %597 }
 0x6c2   :  { %2028 = vrcp.f32 %v598_v61 }
 0x6c5   :  { %v603_v62 = vpop.permute.xlu1 %602 }
 0x6c6   :  { %v608_v63 = vsel %vm265_vm7, %v603_v62, 0  ;;  %v1727_v62 = vld [vmem:[#allocation3 + $0xac] ss:$0 sm:$0xff] }
 0x6c7   :  { %1883 = vmatpush3.bf16.msra.mxu0 %v608_v63 }
 0x6c8   :  { %1896 = vmatprep.subr.bf16.mxu0 %v2118_v1 }
 0x6cf   :  { %v2029_v0 = vpop.eup %2028 }
 0x6d0   :  { %v600_v2 = vmul.f32 %v2029_v0, %v2023_v48 }
 0x6d2   :  { %v601_v3 = vpack.c.bf16 %v600_v2, %v600_v2 }
 0x6d4   :  { %1885 = vmatmul.mubr.msk.bf16.vlgmr.msra.gmra.mxu0 %vm247_vm6, %v601_v3  ;;  %v1728_v3 = vld [vmem:[#allocation3 + $0xad] ss:$0 sm:$0xff] }
 0x6d5   :  { %1900 = vmatprep.mubr.msk.bf16.mxu0 %vm2119_vm0, %v2118_v1 }
 0x75f   :  { %v415_v4 = vpop.f32.mrf.mxu0 }
 0x760   :  { %422 = vrot.lane.b32.xlu0 %v415_v4, %s2125_s14 }
 0x761   :  { %v1862_v5 = vpop.f32.mrf.mxu0 }
 0x763   :  { %v418_v6 = vpop.f32.mrf.mxu0 }
 0x765   :  { %v1863_v7 = vpop.f32.mrf.mxu0 }
 0x767   :  { %v532_v8 = vpop.f32.mrf.mxu0 }
 0x768   :  { %538 = vst.msk [vmem:[#allocation2 + $0x8] sm:$0xff] %vm199_vm5, %v532_v8  ;;  %v131_v8 = vld [vmem:[#allocation3 + $0x98] sm:$0xff] }
 0x769   :  { %v1874_v9 = vpop.f32.mrf.mxu0 }
 0x76a   :  { %v132_v9 = vld [vmem:[#allocation3 + $0xa0] sm:$0xff] }
 0x76b   :  { %v535_v10 = vpop.f32.mrf.mxu0 }
 0x76c   :  { %v129_v10 = vld [vmem:[#allocation3 + $0x88] sm:$0xff] }
 0x76d   :  { %v1875_v11 = vpop.f32.mrf.mxu0  ;;  %v135_v13 = vpack.c.bf16 %v130_v12, %v129_v10 }
 0x76e   :  { %v136_v11 = vpack.c.bf16 %v132_v9, %v131_v8  ;;  %v904_v8 = vld [vmem:[#allocation3 + $0xb8] sm:$0xff] }
 0x794   :  { %v644_v18 = vpop.f32.mrf.mxu0 }
 0x795   :  { %651 = vrot.lane.b32.xlu1 %v644_v18, %s2125_s14  ;;  %v126_v18 = vld [vmem:[#allocation3 + $0x70] sm:$0xff] }
 0x796   :  { %v1886_v19 = vpop.f32.mrf.mxu0 }
 0x797   :  { %v133_v19 = vpack.c.bf16 %v126_v18, %v125_v17  ;;  %v1733_v18 = vld [vmem:[#allocation3 + $0xae] ss:$0 sm:$0xff] }
 0x798   :  { %v647_v20 = vpop.f32.mrf.mxu0 }
 0x799   :  { %v1729_v20 = vld [vmem:[#allocation3 + $0xaa] ss:$0 sm:$0xff] }
 0x79a   :  { %v1887_v21 = vpop.f32.mrf.mxu0 }
 0x7d2   :  { %v423_v22 = vpop.permute.xlu0 %422 }
 0x7d3   :  { %426 = vst.msk [vmem:[#allocation2] sm:$0xff] %vm425_vm8, %v423_v22 }
 0x7da   :  { %v655_v24 = vld [vmem:[#allocation2] sm:$0xff] }
 0x807   :  { %v652_v23 = vpop.permute.xlu1 %651 }
 0x808   :  { %654 = vst.msk [vmem:[#allocation2 + $0x8] sm:$0xff] %vm425_vm8, %v652_v23 }
 0x80f   :  { %v656_v25 = vld [vmem:[#allocation2 + $0x8] sm:$0xff] }
 0x810   :  { %v657_v26 = vpack.c.bf16 %v656_v25, %v655_v24 }
 0x812   :  { %1893 = vmatmul.mubr.msk.bf16.vlgmr.msra.gmra.mxu1 %vm150_vm4, %v657_v26 }
 0x813   :  { %1912 = vmatprep.mubr.msk.bf16.mxu1 %vm2119_vm0, %v2118_v1  ;;  %1905 = vmatpush3.bf16.msra.mxu1 %v136_v11 }
 0x814   :  { %1906 = vmatprep.subr.bf16.mxu1 %v2118_v1 }
 0x817   :  { %1907 = vmatpush3.bf16.msra.mxu1 %v135_v13 }
 0x818   :  { %1908 = vmatprep.subr.bf16.mxu1 %v2118_v1 }
 0x81b   :  { %1909 = vmatpush3.bf16.msra.mxu1 %v134_v16 }
 0x81c   :  { %1910 = vmatprep.subr.bf16.mxu1 %v2118_v1 }
 0x81f   :  { %1911 = vmatpush3.bf16.msra.mxu1 %v133_v19 }
 0x820   :  { %1930 = vmatprep.subr.bf16.mxu1 %v2118_v1 }
 0x8d2   :  { %v699_v28 = vpop.f32.mrf.mxu1 }
 0x8d3   :  { %v700_v29 = vadd.f32 %v1725_v27, %v699_v28 }
 0x8d4   :  { %v1894_v30 = vpop.f32.mrf.mxu1 }
 0x8d5   :  { %v706_v31 = vadd.f32 %v700_v29, %v2200_v33 }
 0x8d6   :  { %v702_v32 = vpop.f32.mrf.mxu1 }
 0x8d7   :  { %v703_v35 = vadd.f32 %v1725_v27, %v702_v32  ;;  %v708_v36 = vsel %vm150_vm4, %v706_v31, 0.0 }
 0x8d8   :  { %709 = vadd.xlane.f32.xlu0 %v708_v36  ;;  %v1895_v37 = vpop.f32.mrf.mxu1 }
 0x8d9   :  { %v707_v38 = vadd.f32 %v703_v35, %v2202_v34  ;;  %v124_v34 = vpack.c.bf16 %v122_v51, %v121_v50 }
 0x8db   :  { %v711_v39 = vsel %vm150_vm4, %v707_v38, 0.0  ;;  %1897 = vmatpush3.bf16.msra.mxu0 %v124_v34 }
 0x8dc   :  { %712 = vadd.xlane.f32.xlu1 %v711_v39  ;;  %1898 = vmatprep.subr.bf16.mxu0 %v2118_v1 }
 0x8df   :  { %1899 = vmatpush3.bf16.msra.mxu0 %v123_v55 }
 0x8e0   :  { %1916 = vmatprep.subr.bf16.mxu0 %v2118_v1 }
 0x961   :  { %v710_v40 = vpop.xlane.xlu0 %709 }
 0x962   :  { %v715_v42 = vmul.f32 0.03125, %v710_v40 }
 0x964   :  { %v717_v43 = vsub.f32 %v706_v31, %v715_v42 }
 0x965   :  { %v713_v44 = vpop.xlane.xlu1 %712 }
 0x966   :  { %v716_v45 = vmul.f32 0.03125, %v713_v44  ;;  %v719_v46 = vmul.f32 %v717_v43, %v717_v43 }
 0x968   :  { %v718_v47 = vsub.f32 %v707_v38, %v716_v45  ;;  %v721_v33 = vsel %vm150_vm4, %v719_v46, 0.0 }
 0x969   :  { %722 = vadd.xlane.f32.xlu0 %v721_v33 }
 0x96a   :  { %v720_v48 = vmul.f32 %v718_v47, %v718_v47 }
 0x96c   :  { %v724_v49 = vsel %vm150_vm4, %v720_v48, 0.0  ;;  %v1731_v48 = vld [vmem:[#allocation3 + $0xab] ss:$0 sm:$0xff] }
 0x96d   :  { %725 = vadd.xlane.f32.xlu0 %v724_v49 }
 0x9f2   :  { %v723_v41 = vpop.xlane.xlu0 %722 }
 0x9f3   :  { %v727_v56 = vmul.f32 0.03125, %v723_v41 }
 0x9f5   :  { %v729_v57 = vadd.f32 1e-05, %v727_v56 }
 0x9f6   :  { %v726_v58 = vpop.xlane.xlu0 %725 }
 0x9f7   :  { %2030 = vrsqrt.f32 %v729_v57  ;;  %v728_v53 = vmul.f32 0.03125, %v726_v58 }
 0x9f9   :  { %v730_v59 = vadd.f32 1e-05, %v728_v53 }
 0x9fb   :  { %2032 = vrsqrt.f32 %v730_v59 }
 0xa04   :  { %v2031_v60 = vpop.eup %2030 }
 0xa05   :  { %v733_v61 = vmul.f32 %v2031_v60, %v717_v43 }
 0xa07   :  { %v739_v2 = vmul.f32 %v1727_v62, %v733_v61 }
 0xa08   :  { %v2033_v63 = vpop.eup %2032 }
 0xa09   :  { %v734_v0 = vmul.f32 %v2033_v63, %v718_v47  ;;  %v745_v5 = vadd.f32 %v1728_v3, %v739_v2 }
 0xa0b   :  { %v740_v4 = vmul.f32 %v1727_v62, %v734_v0 }
 0xa0d   :  { %v2302_v6 = vadd.f32 %v1728_v3, %v740_v4  ;;  %v905_v4 = vld [vmem:[#allocation3 + $0xc0] sm:$0xff] }
 0xa0f   :  { %v747_v7 = vpack.c.bf16 %v2302_v6, %v745_v5 }
 0xa11   :  { %1901 = vmatmul.mubr.msk.bf16.vlgmr.msra.gmra.mxu0 %vm150_vm4, %v747_v7  ;;  %v903_v7 = vld [vmem:[#allocation3 + $0xb0] sm:$0xff] }
 0xa12   :  { %1920 = vmatprep.mubr.msk.bf16.mxu0 %vm2119_vm0, %v2118_v1  ;;  %v907_v9 = vpack.c.bf16 %v904_v8, %v903_v7 }
 0xad1   :  { %v789_v21 = vpop.f32.mrf.mxu0 }
 0xad2   :  { %v790_v22 = vadd.f32 %v1729_v20, %v789_v21 }
 0xad3   :  { %v1902_v23 = vpop.f32.mrf.mxu0 }
 0xad4   :  { %v798_v24 = vmul.f32 0.044715, %v790_v22  ;;  %v796_v43 = vmul.f32 0.5, %v790_v22 }
 0xad5   :  { %v792_v25 = vpop.f32.mrf.mxu0 }
 0xad6   :  { %v800_v26 = vmul.f32 %v798_v24, %v790_v22  ;;  %v793_v27 = vadd.f32 %v1729_v20, %v792_v25 }
 0xad7   :  { %v1903_v28 = vpop.f32.mrf.mxu0 }
 0xad8   :  { %v802_v29 = vmul.f32 %v800_v26, %v790_v22  ;;  %v799_v30 = vmul.f32 0.044715, %v793_v27  ;;  %v797_v44 = vmul.f32 0.5, %v793_v27 }
 0xada   :  { %v804_v31 = vadd.f32 %v802_v29, %v790_v22  ;;  %v801_v32 = vmul.f32 %v799_v30, %v793_v27  ;;  %v1734_v22 = vld [vmem:[#allocation3 + $0xaf] ss:$0 sm:$0xff] }
 0xadc   :  { %v806_v35 = vmul.f32 0.7978846, %v804_v31  ;;  %v803_v36 = vmul.f32 %v801_v32, %v793_v27 }
 0xade   :  { %2034 = vtanh.f32 %v806_v35  ;;  %v805_v37 = vadd.f32 %v803_v36, %v793_v27  ;;  %v1735_v27 = vld [vmem:[#allocation3 + $0x150] ss:$0 sm:$0xff] }
 0xae0   :  { %v807_v38 = vmul.f32 0.7978846, %v805_v37 }
 0xae2   :  { %2036 = vtanh.f32 %v807_v38 }
 0xaeb   :  { %v2035_v39 = vpop.eup %2034 }
 0xaec   :  { %v810_v40 = vadd.f32 1.0, %v2035_v39 }
 0xaee   :  { %v812_v46 = vmul.f32 %v810_v40, %v796_v43 }
 0xaef   :  { %v2037_v42 = vpop.eup %2036 }
 0xaf0   :  { %v811_v45 = vadd.f32 1.0, %v2037_v42 }
 0xaf2   :  { %v813_v47 = vmul.f32 %v811_v45, %v797_v44 }
 0xaf4   :  { %v814_v33 = vpack.c.bf16 %v813_v47, %v812_v46 }
 0xaf6   :  { %1913 = vmatmul.mubr.msk.bf16.vlgmr.msra.gmra.mxu1 %vm59_vm3, %v814_v33 }
 0xaf7   :  { %1932 = vmatprep.mubr.msk.bf16.mxu1 %vm2119_vm0, %v2118_v1 }
 0xbb6   :  { %v856_v49 = vpop.f32.mrf.mxu1 }
 0xbb7   :  { %v857_v50 = vadd.f32 %v1731_v48, %v856_v49 }
 0xbb8   :  { %v1914_v51 = vpop.f32.mrf.mxu1 }
 0xbb9   :  { %v863_v34 = vadd.f32 %v857_v50, %v745_v5  ;;  %v906_v5 = vld [vmem:[#allocation3 + $0xc8] sm:$0xff] }
 0xbba   :  { %v859_v52 = vpop.f32.mrf.mxu1 }
 0xbbb   :  { %v860_v54 = vadd.f32 %v1731_v48, %v859_v52  ;;  %v865_v55 = vsel %vm150_vm4, %v863_v34, 0.0 }
 0xbbc   :  { %866 = vadd.xlane.f32.xlu1 %v865_v55  ;;  %v1915_v41 = vpop.f32.mrf.mxu1 }
 0xbbd   :  { %v864_v56 = vadd.f32 %v860_v54, %v2302_v6  ;;  %v908_v6 = vpack.c.bf16 %v906_v5, %v905_v4 }
 0xbbf   :  { %v868_v57 = vsel %vm150_vm4, %v864_v56, 0.0  ;;  %1917 = vmatpush3.bf16.msra.mxu0 %v908_v6 }
 0xbc0   :  { %869 = vadd.xlane.f32.xlu0 %v868_v57  ;;  %1918 = vmatprep.subr.bf16.mxu0 %v2118_v1 }
 0xbc3   :  { %1919 = vmatpush3.bf16.msra.mxu0 %v907_v9 }
 0xbc4   :  { %1924 = vmatprep.subr.bf16.mxu0 %v2118_v1 }
 0xc45   :  { %v867_v58 = vpop.xlane.xlu1 %866 }
 0xc46   :  { %v871_v53 = vmul.f32 0.03125, %v867_v58 }
 0xc48   :  { %v873_v59 = vsub.f32 %v863_v34, %v871_v53 }
 0xc49   :  { %v870_v60 = vpop.xlane.xlu0 %869 }
 0xc4a   :  { %v872_v61 = vmul.f32 0.03125, %v870_v60  ;;  %v875_v62 = vmul.f32 %v873_v59, %v873_v59 }
 0xc4c   :  { %v874_v63 = vsub.f32 %v864_v56, %v872_v61  ;;  %v877_v0 = vsel %vm150_vm4, %v875_v62, 0.0 }
 0xc4d   :  { %878 = vadd.xlane.f32.xlu1 %v877_v0 }
 0xc4e   :  { %v876_v2 = vmul.f32 %v874_v63, %v874_v63 }
 0xc50   :  { %v880_v3 = vsel %vm150_vm4, %v876_v2, 0.0 }
 0xc51   :  { %881 = vadd.xlane.f32.xlu0 %v880_v3 }
 0xcd6   :  { %v879_v10 = vpop.xlane.xlu1 %878 }
 0xcd7   :  { %v883_v11 = vmul.f32 0.03125, %v879_v10 }
 0xcd9   :  { %v885_v12 = vadd.f32 1e-05, %v883_v11 }
 0xcda   :  { %v882_v13 = vpop.xlane.xlu0 %881 }
 0xcdb   :  { %2038 = vrsqrt.f32 %v885_v12  ;;  %v884_v14 = vmul.f32 0.03125, %v882_v13 }
 0xcdd   :  { %v886_v15 = vadd.f32 1e-05, %v884_v14 }
 0xcdf   :  { %2040 = vrsqrt.f32 %v886_v15 }
 0xce8   :  { %v2039_v16 = vpop.eup %2038 }
 0xce9   :  { %v889_v17 = vmul.f32 %v2039_v16, %v873_v59 }
 0xceb   :  { %v895_v21 = vmul.f32 %v1733_v18, %v889_v17 }
 0xcec   :  { %v2041_v19 = vpop.eup %2040 }
 0xced   :  { %v890_v20 = vmul.f32 %v2041_v19, %v874_v63  ;;  %v2322_v24 = vadd.f32 %v1734_v22, %v895_v21 }
 0xcef   :  { %v896_v23 = vmul.f32 %v1733_v18, %v890_v20 }
 0xcf1   :  { %v2324_v25 = vadd.f32 %v1734_v22, %v896_v23 }
 0xcf3   :  { %v941_v26 = vpack.c.bf16 %v2324_v25, %v2322_v24 }
 0xcf5   :  { %1921 = vmatmul.mubr.msk.bf16.vlgmr.msra.gmra.mxu0 %vm150_vm4, %v941_v26 }
 0xcf6   :  { %1926 = vmatprep.mubr.msk.bf16.mxu0 %vm2119_vm0, %v2118_v1 }
 0xdb5   :  { %v983_v28 = vpop.f32.mrf.mxu0 }
 0xdb6   :  { %v984_v29 = vadd.f32 %v1735_v27, %v983_v28 }
 0xdb7   :  { %v1922_v30 = vpop.f32.mrf.mxu0 }
 0xdb8   :  { %v2331_v31 = vpack.c.bf16 %v984_v29, %v984_v29 }
 0xdb9   :  { %v986_v32 = vpop.f32.mrf.mxu0 }
 0xdba   :  { %v987_v35 = vadd.f32 %v1735_v27, %v986_v32  ;;  %1104 = vrot.lane.b32.xlu0 %v2331_v31, %s2121_s10  ;;  %992 = vrot.lane.b32.xlu1 %v2331_v31, %s2120_s1 }
 0xdbb   :  { %v1923_v36 = vpop.f32.mrf.mxu0 }
 0xdbc   :  { %v2337_v37 = vpack.c.bf16 %v987_v35, %v987_v35 }
 0xdbe   :  { %1102 = vrot.lane.b32.xlu1 %v2331_v31, %s2122_s11  ;;  %1332 = vrot.lane.b32.xlu0 %v2337_v37, %s2121_s10 }
 0xdc2   :  { %1220 = vrot.lane.b32.xlu1 %v2337_v37, %s2120_s1 }
 0xdc6   :  { %1330 = vrot.lane.b32.xlu1 %v2337_v37, %s2122_s11 }
 0xe2c   :  { %v993_v38 = vpop.permute.xlu1 %992  ;;  %v1105_v40 = vpop.permute.xlu0 %1104 }
 0xe2d   :  { %v998_v39 = vsel %vm199_vm5, %v993_v38, 0  ;;  %v1110_v43 = vsel %vm199_vm5, %v1105_v40, 0 }
 0xe2e   :  { %1925 = vmatpush3.bf16.xpose.msra.mxu0 %v998_v39 }
 0xe2f   :  { %1936 = vmatprep.subr.bf16.mxu0 %v2118_v1 }
 0xe30   :  { %v1103_v42 = vpop.permute.xlu1 %1102  ;;  %v1333_v46 = vpop.permute.xlu0 %1332 }
 0xe31   :  { %v1338_v47 = vsel %vm199_vm5, %v1333_v46, 0 }
 0xe34   :  { %v1221_v44 = vpop.permute.xlu1 %1220 }
 0xe35   :  { %1927 = vmatmul.mubr.msk.bf16.vlgmr.msra.gmra.mxu0 %vm199_vm5, %v2331_v31  ;;  %v1226_v45 = vsel %vm199_vm5, %v1221_v44, 0 }
 0xe36   :  { %1937 = vmatpush3.bf16.xpose.msra.mxu0 %v1110_v43  ;;  %1938 = vmatprep.mubr.msk.bf16.mxu0 %vm2119_vm0, %v2118_v1 }
 0xe37   :  { %1948 = vmatprep.subr.bf16.mxu0 %v2118_v1 }
 0xe38   :  { %v1331_v33 = vpop.permute.xlu1 %1330 }
 0xe3d   :  { %1939 = vmatmul.mubr.msk.bf16.vlgmr.msra.gmra.mxu0 %vm199_vm5, %v1103_v42 }
 0xe3e   :  { %1949 = vmatpush3.bf16.xpose.msra.mxu0 %v1226_v45  ;;  %1950 = vmatprep.mubr.msk.bf16.mxu0 %vm2119_vm0, %v2118_v1 }
 0xe3f   :  { %1960 = vmatprep.subr.bf16.mxu0 %v2118_v1 }
 0xe45   :  { %1951 = vmatmul.mubr.msk.bf16.vlgmr.msra.gmra.mxu0 %vm199_vm5, %v2337_v37 }
 0xe46   :  { %1961 = vmatpush3.bf16.xpose.msra.mxu0 %v1338_v47  ;;  %1962 = vmatprep.mubr.msk.bf16.mxu0 %vm2119_vm0, %v2118_v1 }
 0xe47   :  { %1972 = vmatprep.subr.bf16.mxu0 %v2118_v1 }
 0xe4d   :  { %1963 = vmatmul.mubr.msk.bf16.vlgmr.msra.gmra.mxu0 %vm199_vm5, %v1331_v33 }
 0xe4e   :  { %1976 = vmatprep.mubr.msk.bf16.mxu0 %vm2119_vm0, %v2118_v1 }
 0xef5   :  { %v1034_v48 = vpop.f32.mrf.mxu0 }
 0xef6   :  { %v1040_v49 = vmul.f32 0.25, %v1034_v48 }
 0xef7   :  { %v1928_v50 = vpop.f32.mrf.mxu0 }
 0xef8   :  { %v1041_v51 = vsel %vm247_vm6, %v1040_v49, -inf }
 0xef9   :  { %1042 = vmax.xlane.f32.xlu0 %v1041_v51  ;;  %v1037_v34 = vpop.f32.mrf.mxu0 }
 0xefb   :  { %v1929_v52 = vpop.f32.mrf.mxu0 }
 0xefd   :  { %v1146_v54 = vpop.f32.mrf.mxu0 }
 0xefe   :  { %v1152_v55 = vmul.f32 0.25, %v1146_v54 }
 0xeff   :  { %v1940_v41 = vpop.f32.mrf.mxu0 }
 0xf00   :  { %v1153_v56 = vsel %vm247_vm6, %v1152_v55, -inf }
 0xf01   :  { %1154 = vmax.xlane.f32.xlu1 %v1153_v56  ;;  %v1149_v57 = vpop.f32.mrf.mxu0 }
 0xf03   :  { %v1941_v58 = vpop.f32.mrf.mxu0 }
 0xf05   :  { %v1262_v53 = vpop.f32.mrf.mxu0 }
 0xf06   :  { %v1268_v59 = vmul.f32 0.25, %v1262_v53 }
 0xf07   :  { %v1952_v60 = vpop.f32.mrf.mxu0 }
 0xf08   :  { %v1269_v61 = vsel %vm247_vm6, %v1268_v59, -inf }
 0xf09   :  { %1270 = vmax.xlane.f32.xlu0 %v1269_v61  ;;  %v1265_v62 = vpop.f32.mrf.mxu0  ;;  %v911_v61 = vld [vmem:[#allocation3 + $0xe0] sm:$0xff] }
 0xf0a   :  { %v912_v62 = vld [vmem:[#allocation3 + $0xe8] sm:$0xff] }
 0xf0b   :  { %v1953_v63 = vpop.f32.mrf.mxu0 }
 0xf0c   :  { %v909_v63 = vld [vmem:[#allocation3 + $0xd0] sm:$0xff] }
 0xf0d   :  { %v1374_v0 = vpop.f32.mrf.mxu0 }
 0xf0e   :  { %v1380_v2 = vmul.f32 0.25, %v1374_v0  ;;  %v914_v0 = vpack.c.bf16 %v912_v62, %v911_v61  ;;  %v927_v61 = vld [vmem:[#allocation3 + $0x140] sm:$0xff]  ;;  %v928_v62 = vld [vmem:[#allocation3 + $0x148] sm:$0xff] }
 0xf0f   :  { %v1964_v3 = vpop.f32.mrf.mxu0 }
 0xf10   :  { %v1381_v4 = vsel %vm247_vm6, %v1380_v2, -inf  ;;  %1973 = vmatpush3.bf16.msra.mxu0 %v914_v0  ;;  %v932_v0 = vpack.c.bf16 %v928_v62, %v927_v61 }
 0xf11   :  { %1382 = vmax.xlane.f32.xlu0 %v1381_v4  ;;  %v1377_v5 = vpop.f32.mrf.mxu0  ;;  %1974 = vmatprep.subr.bf16.mxu0 %v2118_v1 }
 0xf13   :  { %v1965_v6 = vpop.f32.mrf.mxu0 }
 0xf82   :  { %v1043_v7 = vpop.xlane.xlu0 %1042 }
 0xf83   :  { %v1044_v8 = vsub.f32 %v1040_v49, %v1043_v7 }
 0xf85   :  { %v1045_v9 = vmul.f32 1.442695, %v1044_v8 }
 0xf87   :  { %2042 = vpow2.f32 %v1045_v9 }
 0xf8a   :  { %v1155_v10 = vpop.xlane.xlu1 %1154 }
 0xf8b   :  { %v1156_v11 = vsub.f32 %v1152_v55, %v1155_v10 }
 0xf8d   :  { %v1157_v12 = vmul.f32 1.442695, %v1156_v11 }
 0xf8f   :  { %2044 = vpow2.f32 %v1157_v12 }
 0xf92   :  { %v1271_v15 = vpop.xlane.xlu0 %1270 }
 0xf93   :  { %v1272_v23 = vsub.f32 %v1268_v59, %v1271_v15 }
 0xf94   :  { %v2043_v13 = vpop.eup %2042 }
 0xf95   :  { %v1047_v14 = vsel %vm247_vm6, %v2043_v13, 0.0  ;;  %v1273_v26 = vmul.f32 1.442695, %v1272_v23 }
 0xf96   :  { %1048 = vadd.xlane.f32.xlu1 %v1047_v14 }
 0xf9a   :  { %v1383_v16 = vpop.xlane.xlu0 %1382 }
 0xf9b   :  { %v1384_v17 = vsub.f32 %v1380_v2, %v1383_v16  ;;  %v910_v2 = vld [vmem:[#allocation3 + $0xd8] sm:$0xff] }
 0xf9c   :  { %v2045_v18 = vpop.eup %2044  ;;  %v913_v3 = vpack.c.bf16 %v910_v2, %v909_v63  ;;  %v925_v63 = vld [vmem:[#allocation3 + $0x130] sm:$0xff]  ;;  %v926_v2 = vld [vmem:[#allocation3 + $0x138] sm:$0xff] }
 0xf9d   :  { %v1385_v19 = vmul.f32 1.442695, %v1384_v17  ;;  %v1159_v20 = vsel %vm247_vm6, %v2045_v18, 0.0  ;;  %v1745_v17 = vld [vmem:[#allocation3 + $0x151] ss:$0 sm:$0xff] }
 0xf9e   :  { %1160 = vadd.xlane.f32.xlu0 %v1159_v20  ;;  %1975 = vmatpush3.bf16.msra.mxu0 %v913_v3  ;;  %v931_v3 = vpack.c.bf16 %v926_v2, %v925_v63  ;;  %v1753_v63 = vld [vmem:[#allocation3 + $0x156] ss:$0 sm:$0xff]  ;;  %v1754_v2 = vld [vmem:[#allocation3 + $0x157] ss:$0 sm:$0xff] }
 0xf9f   :  { %2046 = vpow2.f32 %v1385_v19  ;;  %1988 = vmatprep.subr.bf16.mxu0 %v2118_v1 }
 0xfa0   :  { %2048 = vpow2.f32 %v1273_v26 }
 0xfa7   :  { %1053 = vrot.lane.b32.xlu1 %v2331_v31, %s2123_s12 }
 0xfac   :  { %v2047_v21 = vpop.eup %2046 }
 0xfad   :  { %v1387_v22 = vsel %vm247_vm6, %v2047_v21, 0.0  ;;  %v2049_v27 = vpop.eup %2048 }
 0xfae   :  { %1388 = vadd.xlane.f32.xlu0 %v1387_v22  ;;  %v1275_v28 = vsel %vm247_vm6, %v2049_v27, 0.0 }
 0xfc4   :  { %1165 = vrot.lane.b32.xlu0 %v2331_v31, %s2124_s13 }
 0xfcb   :  { %1276 = vadd.xlane.f32.xlu1 %v1275_v28 }
 0xfdc   :  { %1281 = vrot.lane.b32.xlu1 %v2337_v37, %s2123_s12 }
 0xfe0   :  { %1393 = vrot.lane.b32.xlu1 %v2337_v37, %s2124_s13 }
0x101f   :  { %v1049_v29 = vpop.xlane.xlu1 %1048 }
0x1020   :  { %2050 = vrcp.f32 %v1049_v29 }
0x1023   :  { %v1054_v30 = vpop.permute.xlu1 %1053 }
0x1024   :  { %v1059_v32 = vsel %vm265_vm7, %v1054_v30, 0 }
0x1025   :  { %1931 = vmatpush3.bf16.msra.mxu1 %v1059_v32 }
0x1026   :  { %1942 = vmatprep.subr.bf16.mxu1 %v2118_v1 }
0x1027   :  { %v1161_v35 = vpop.xlane.xlu0 %1160 }
0x1028   :  { %2052 = vrcp.f32 %v1161_v35 }
0x102d   :  { %v2051_v31 = vpop.eup %2050 }
0x102e   :  { %v1051_v36 = vmul.f32 %v2051_v31, %v2043_v13 }
0x1030   :  { %v1052_v38 = vpack.c.bf16 %v1051_v36, %v1051_v36 }
0x1032   :  { %1933 = vmatmul.mubr.msk.bf16.vlgmr.msra.gmra.mxu1 %vm247_vm6, %v1052_v38 }
0x1033   :  { %1944 = vmatprep.mubr.msk.bf16.mxu1 %vm2119_vm0, %v2118_v1 }
0x1035   :  { %v2053_v39 = vpop.eup %2052 }
0x1036   :  { %v1163_v40 = vmul.f32 %v2053_v39, %v2045_v18 }
0x1037   :  { %v1389_v37 = vpop.xlane.xlu0 %1388 }
0x1038   :  { %v1164_v44 = vpack.c.bf16 %v1163_v40, %v1163_v40 }
0x103b   :  { %v1166_v42 = vpop.permute.xlu0 %1165 }
0x103c   :  { %v1171_v43 = vsel %vm265_vm7, %v1166_v42, 0  ;;  %v917_v42 = vld [vmem:[#allocation3 + $0x100] sm:$0xff] }
0x103d   :  { %1943 = vmatpush3.bf16.msra.mxu1 %v1171_v43  ;;  %v918_v43 = vld [vmem:[#allocation3 + $0x108] sm:$0xff] }
0x103e   :  { %1954 = vmatprep.subr.bf16.mxu1 %v2118_v1 }
0x1040   :  { %1945 = vmatmul.mubr.msk.bf16.vlgmr.msra.gmra.mxu1 %vm247_vm6, %v1164_v44  ;;  %v915_v44 = vld [vmem:[#allocation3 + $0xf0] sm:$0xff] }
0x1041   :  { %1956 = vmatprep.mubr.msk.bf16.mxu1 %vm2119_vm0, %v2118_v1 }
0x1054   :  { %v1277_v45 = vpop.xlane.xlu1 %1276 }
0x1055   :  { %2054 = vrcp.f32 %v1277_v45  ;;  %v916_v45 = vld [vmem:[#allocation3 + $0xf8] sm:$0xff] }
0x1056   :  { %2056 = vrcp.f32 %v1389_v37 }
0x1058   :  { %v1282_v46 = vpop.permute.xlu1 %1281 }
0x1059   :  { %v1287_v47 = vsel %vm265_vm7, %v1282_v46, 0  ;;  %v919_v46 = vpack.c.bf16 %v916_v45, %v915_v44 }
0x105a   :  { %1955 = vmatpush3.bf16.msra.mxu1 %v1287_v47 }
0x105b   :  { %1966 = vmatprep.subr.bf16.mxu1 %v2118_v1 }
0x105c   :  { %v1394_v49 = vpop.permute.xlu1 %1393 }
0x105d   :  { %v1399_v34 = vsel %vm265_vm7, %v1394_v49, 0 }
0x1062   :  { %v2055_v33 = vpop.eup %2054 }
0x1063   :  { %v1279_v48 = vmul.f32 %v2055_v33, %v2049_v27  ;;  %v2057_v51 = vpop.eup %2056 }
0x1064   :  { %v1391_v52 = vmul.f32 %v2057_v51, %v2047_v21 }
0x1065   :  { %v1280_v50 = vpack.c.bf16 %v1279_v48, %v1279_v48 }
0x1066   :  { %v1392_v54 = vpack.c.bf16 %v1391_v52, %v1391_v52 }
0x1067   :  { %1957 = vmatmul.mubr.msk.bf16.vlgmr.msra.gmra.mxu1 %vm247_vm6, %v1280_v50 }
0x1068   :  { %1967 = vmatpush3.bf16.msra.mxu1 %v1399_v34  ;;  %1968 = vmatprep.mubr.msk.bf16.mxu1 %vm2119_vm0, %v2118_v1 }
0x1069   :  { %1980 = vmatprep.subr.bf16.mxu1 %v2118_v1 }
0x106f   :  { %1969 = vmatmul.mubr.msk.bf16.vlgmr.msra.gmra.mxu1 %vm247_vm6, %v1392_v54  ;;  %v1747_v54 = vld [vmem:[#allocation3 + $0x154] ss:$0 sm:$0xff] }
0x1070   :  { %1984 = vmatprep.mubr.msk.bf16.mxu1 %vm2119_vm0, %v2118_v1 }
0x10f2   :  { %v1095_v55 = vpop.f32.mrf.mxu1 }
0x10f3   :  { %1101 = vst.msk [vmem:[#allocation2] sm:$0xff] %vm199_vm5, %v1095_v55 }
0x10f4   :  { %v1934_v41 = vpop.f32.mrf.mxu1 }
0x10f6   :  { %v1098_v56 = vpop.f32.mrf.mxu1 }
0x10f8   :  { %v1935_v57 = vpop.f32.mrf.mxu1 }
0x10f9   :  { %v1748_v57 = vld [vmem:[#allocation3 + $0x155] ss:$0 sm:$0xff] }
0x1100   :  { %v1207_v58 = vpop.f32.mrf.mxu1 }
0x1101   :  { %1214 = vrot.lane.b32.xlu0 %v1207_v58, %s2125_s14 }
0x1102   :  { %v1946_v53 = vpop.f32.mrf.mxu1 }
0x1104   :  { %v1210_v59 = vpop.f32.mrf.mxu1 }
0x1106   :  { %v1947_v60 = vpop.f32.mrf.mxu1 }
0x1127   :  { %v1323_v4 = vpop.f32.mrf.mxu1 }
0x1128   :  { %1329 = vst.msk [vmem:[#allocation2 + $0x8] sm:$0xff] %vm199_vm5, %v1323_v4  ;;  %v923_v4 = vld [vmem:[#allocation3 + $0x120] sm:$0xff] }
0x1129   :  { %v1958_v5 = vpop.f32.mrf.mxu1 }
0x112a   :  { %v924_v5 = vld [vmem:[#allocation3 + $0x128] sm:$0xff] }
0x112b   :  { %v1326_v6 = vpop.f32.mrf.mxu1 }
0x112c   :  { %v930_v6 = vpack.c.bf16 %v924_v5, %v923_v4 }
0x112d   :  { %v1959_v7 = vpop.f32.mrf.mxu1 }
0x112e   :  { %v921_v7 = vld [vmem:[#allocation3 + $0x110] sm:$0xff] }
0x112f   :  { %v1435_v8 = vpop.f32.mrf.mxu1 }
0x1130   :  { %1442 = vrot.lane.b32.xlu1 %v1435_v8, %s2125_s14  ;;  %v922_v8 = vld [vmem:[#allocation3 + $0x118] sm:$0xff] }
0x1131   :  { %v1970_v9 = vpop.f32.mrf.mxu1 }
0x1132   :  { %v929_v9 = vpack.c.bf16 %v922_v8, %v921_v7 }
0x1133   :  { %v1438_v10 = vpop.f32.mrf.mxu1 }
0x1134   :  { %v1749_v10 = vld [vmem:[#allocation3 + $0x152] ss:$0 sm:$0xff] }
0x1135   :  { %v1971_v11 = vpop.f32.mrf.mxu1 }
0x1173   :  { %v1215_v12 = vpop.permute.xlu0 %1214 }
0x1174   :  { %1217 = vst.msk [vmem:[#allocation2] sm:$0xff] %vm425_vm8, %v1215_v12 }
0x117b   :  { %v1446_v14 = vld [vmem:[#allocation2] sm:$0xff] }
0x11a2   :  { %v1443_v13 = vpop.permute.xlu1 %1442 }
0x11a3   :  { %1445 = vst.msk [vmem:[#allocation2 + $0x8] sm:$0xff] %vm425_vm8, %v1443_v13 }
0x11aa   :  { %v1447_v15 = vld [vmem:[#allocation2 + $0x8] sm:$0xff] }
0x11ab   :  { %v1448_v16 = vpack.c.bf16 %v1447_v15, %v1446_v14 }
0x11ad   :  { %1977 = vmatmul.mubr.msk.bf16.vlgmr.msra.gmra.mxu0 %vm150_vm4, %v1448_v16 }
0x11ae   :  { %1996 = vmatprep.mubr.msk.bf16.mxu0 %vm2119_vm0, %v2118_v1  ;;  %1989 = vmatpush3.bf16.msra.mxu0 %v932_v0 }
0x11af   :  { %1990 = vmatprep.subr.bf16.mxu0 %v2118_v1 }
0x11b2   :  { %1991 = vmatpush3.bf16.msra.mxu0 %v931_v3 }
0x11b3   :  { %1992 = vmatprep.subr.bf16.mxu0 %v2118_v1 }
0x11b6   :  { %1993 = vmatpush3.bf16.msra.mxu0 %v930_v6 }
0x11b7   :  { %1994 = vmatprep.subr.bf16.mxu0 %v2118_v1 }
0x11ba   :  { %1995 = vmatpush3.bf16.msra.mxu0 %v929_v9 }
0x126d   :  { %v1490_v18 = vpop.f32.mrf.mxu0 }
0x126e   :  { %v1491_v19 = vadd.f32 %v1745_v17, %v1490_v18 }
0x126f   :  { %v1978_v20 = vpop.f32.mrf.mxu0 }
0x1270   :  { %v1497_v21 = vadd.f32 %v1491_v19, %v2322_v24 }
0x1271   :  { %v1493_v22 = vpop.f32.mrf.mxu0 }
0x1272   :  { %v1494_v23 = vadd.f32 %v1745_v17, %v1493_v22  ;;  %v1499_v26 = vsel %vm150_vm4, %v1497_v21, 0.0 }
0x1273   :  { %1500 = vadd.xlane.f32.xlu0 %v1499_v26  ;;  %v1979_v27 = vpop.f32.mrf.mxu0 }
0x1274   :  { %v1498_v28 = vadd.f32 %v1494_v23, %v2324_v25  ;;  %v920_v25 = vpack.c.bf16 %v918_v43, %v917_v42 }
0x1276   :  { %v1502_v29 = vsel %vm150_vm4, %v1498_v28, 0.0  ;;  %1981 = vmatpush3.bf16.msra.mxu1 %v920_v25 }
0x1277   :  { %1503 = vadd.xlane.f32.xlu1 %v1502_v29  ;;  %1982 = vmatprep.subr.bf16.mxu1 %v2118_v1 }
0x127a   :  { %1983 = vmatpush3.bf16.msra.mxu1 %v919_v46 }
0x12fc   :  { %v1501_v30 = vpop.xlane.xlu0 %1500 }
0x12fd   :  { %v1505_v32 = vmul.f32 0.03125, %v1501_v30 }
0x12ff   :  { %v1507_v35 = vsub.f32 %v1497_v21, %v1505_v32 }
0x1300   :  { %v1504_v31 = vpop.xlane.xlu1 %1503 }
0x1301   :  { %v1506_v36 = vmul.f32 0.03125, %v1504_v31  ;;  %v1509_v38 = vmul.f32 %v1507_v35, %v1507_v35 }
0x1303   :  { %v1508_v39 = vsub.f32 %v1498_v28, %v1506_v36  ;;  %v1511_v24 = vsel %vm150_vm4, %v1509_v38, 0.0 }
0x1304   :  { %1512 = vadd.xlane.f32.xlu0 %v1511_v24  ;;  %v1751_v24 = vld [vmem:[#allocation3 + $0x153] ss:$0 sm:$0xff] }
0x1305   :  { %v1510_v37 = vmul.f32 %v1508_v39, %v1508_v39 }
0x1307   :  { %v1514_v40 = vsel %vm150_vm4, %v1510_v37, 0.0 }
0x1308   :  { %1515 = vadd.xlane.f32.xlu0 %v1514_v40 }
0x138d   :  { %v1513_v47 = vpop.xlane.xlu0 %1512 }
0x138e   :  { %v1517_v33 = vmul.f32 0.03125, %v1513_v47 }
0x1390   :  { %v1519_v48 = vadd.f32 1e-05, %v1517_v33 }
0x1391   :  { %v1516_v49 = vpop.xlane.xlu0 %1515 }
0x1392   :  { %2058 = vrsqrt.f32 %v1519_v48  ;;  %v1518_v50 = vmul.f32 0.03125, %v1516_v49 }
0x1394   :  { %v1520_v51 = vadd.f32 1e-05, %v1518_v50 }
0x1396   :  { %2060 = vrsqrt.f32 %v1520_v51 }
0x139f   :  { %v2059_v34 = vpop.eup %2058 }
0x13a0   :  { %v1523_v52 = vmul.f32 %v2059_v34, %v1507_v35 }
0x13a2   :  { %v1529_v56 = vmul.f32 %v1747_v54, %v1523_v52 }
0x13a3   :  { %v2061_v55 = vpop.eup %2060 }
0x13a4   :  { %v1524_v41 = vmul.f32 %v2061_v55, %v1508_v39  ;;  %v1535_v53 = vadd.f32 %v1748_v57, %v1529_v56 }
0x13a6   :  { %v1530_v58 = vmul.f32 %v1747_v54, %v1524_v41 }
0x13a8   :  { %v1536_v59 = vadd.f32 %v1748_v57, %v1530_v58 }
0x13aa   :  { %v1537_v60 = vpack.c.bf16 %v1536_v59, %v1535_v53 }
0x13ac   :  { %1985 = vmatmul.mubr.msk.bf16.vlgmr.msra.gmra.mxu1 %vm150_vm4, %v1537_v60 }
0x146c   :  { %v1579_v11 = vpop.f32.mrf.mxu1 }
0x146d   :  { %v1580_v12 = vadd.f32 %v1749_v10, %v1579_v11 }
0x146e   :  { %v1986_v13 = vpop.f32.mrf.mxu1 }
0x146f   :  { %v1588_v14 = vmul.f32 0.044715, %v1580_v12  ;;  %v1586_v32 = vmul.f32 0.5, %v1580_v12 }
0x1470   :  { %v1582_v15 = vpop.f32.mrf.mxu1 }
0x1471   :  { %v1590_v16 = vmul.f32 %v1588_v14, %v1580_v12  ;;  %v1583_v17 = vadd.f32 %v1749_v10, %v1582_v15 }
0x1472   :  { %v1987_v18 = vpop.f32.mrf.mxu1 }
0x1473   :  { %v1592_v19 = vmul.f32 %v1590_v16, %v1580_v12  ;;  %v1589_v20 = vmul.f32 0.044715, %v1583_v17  ;;  %v1587_v35 = vmul.f32 0.5, %v1583_v17 }
0x1475   :  { %v1594_v21 = vadd.f32 %v1592_v19, %v1580_v12  ;;  %v1591_v22 = vmul.f32 %v1589_v20, %v1583_v17 }
0x1477   :  { %v1596_v23 = vmul.f32 0.7978846, %v1594_v21  ;;  %v1593_v26 = vmul.f32 %v1591_v22, %v1583_v17 }
0x1479   :  { %2062 = vtanh.f32 %v1596_v23  ;;  %v1595_v27 = vadd.f32 %v1593_v26, %v1583_v17 }
0x147b   :  { %v1597_v28 = vmul.f32 0.7978846, %v1595_v27 }
0x147d   :  { %2064 = vtanh.f32 %v1597_v28 }
0x1486   :  { %v2063_v1 = vpop.eup %2062 }
0x1487   :  { %v1600_v29 = vadd.f32 1.0, %v2063_v1 }
0x1489   :  { %v1602_v36 = vmul.f32 %v1600_v29, %v1586_v32 }
0x148a   :  { %v2065_v30 = vpop.eup %2064 }
0x148b   :  { %v1601_v31 = vadd.f32 1.0, %v2065_v30 }
0x148d   :  { %v1603_v38 = vmul.f32 %v1601_v31, %v1587_v35 }
0x148f   :  { %v1604_v39 = vpack.c.bf16 %v1603_v38, %v1602_v36 }
0x1491   :  { %1997 = vmatmul.mubr.msk.bf16.vlgmr.msra.gmra.mxu0 %vm59_vm3, %v1604_v39 }
0x1551   :  { %v1646_v37 = vpop.f32.mrf.mxu0 }
0x1552   :  { %v1647_v40 = vadd.f32 %v1751_v24, %v1646_v37 }
0x1553   :  { %v1998_v42 = vpop.f32.mrf.mxu0 }
0x1554   :  { %v1653_v43 = vadd.f32 %v1647_v40, %v1535_v53 }
0x1555   :  { %v1649_v25 = vpop.f32.mrf.mxu0 }
0x1556   :  { %v1650_v44 = vadd.f32 %v1751_v24, %v1649_v25  ;;  %v1655_v45 = vsel %vm150_vm4, %v1653_v43, 0.0 }
0x1557   :  { %1656 = vadd.xlane.f32.xlu1 %v1655_v45  ;;  %v1999_v46 = vpop.f32.mrf.mxu0 }
0x1558   :  { %v1654_v47 = vadd.f32 %v1650_v44, %v1536_v59 }
0x155a   :  { %v1658_v33 = vsel %vm150_vm4, %v1654_v47, 0.0 }
0x155b   :  { %1659 = vadd.xlane.f32.xlu0 %v1658_v33 }
0x15e0   :  { %v1657_v48 = vpop.xlane.xlu1 %1656 }
0x15e1   :  { %v1661_v49 = vmul.f32 0.03125, %v1657_v48 }
0x15e3   :  { %v1663_v50 = vsub.f32 %v1653_v43, %v1661_v49 }
0x15e4   :  { %v1660_v51 = vpop.xlane.xlu0 %1659 }
0x15e5   :  { %v1662_v34 = vmul.f32 0.03125, %v1660_v51  ;;  %v1665_v52 = vmul.f32 %v1663_v50, %v1663_v50 }
0x15e7   :  { %v1664_v54 = vsub.f32 %v1654_v47, %v1662_v34  ;;  %v1667_v55 = vsel %vm150_vm4, %v1665_v52, 0.0 }
0x15e8   :  { %1668 = vadd.xlane.f32.xlu1 %v1667_v55 }
0x15e9   :  { %v1666_v41 = vmul.f32 %v1664_v54, %v1664_v54 }
0x15eb   :  { %v1670_v56 = vsel %vm150_vm4, %v1666_v41, 0.0 }
0x15ec   :  { %1671 = vadd.xlane.f32.xlu0 %v1670_v56 }
0x1671   :  { %v1669_v57 = vpop.xlane.xlu1 %1668 }
0x1672   :  { %v1673_v58 = vmul.f32 0.03125, %v1669_v57 }
0x1674   :  { %v1675_v53 = vadd.f32 1e-05, %v1673_v58 }
0x1675   :  { %v1672_v59 = vpop.xlane.xlu0 %1671 }
0x1676   :  { %2066 = vrsqrt.f32 %v1675_v53  ;;  %v1674_v60 = vmul.f32 0.03125, %v1672_v59 }
0x1678   :  { %v1676_v61 = vadd.f32 1e-05, %v1674_v60 }
0x167a   :  { %2068 = vrsqrt.f32 %v1676_v61 }
0x1683   :  { %v2067_v62 = vpop.eup %2066 }
0x1684   :  { %v1679_v0 = vmul.f32 %v2067_v62, %v1663_v50 }
0x1686   :  { %v1685_v3 = vmul.f32 %v1753_v63, %v1679_v0 }
0x1687   :  { %v2069_v4 = vpop.eup %2068 }
0x1688   :  { %v1680_v5 = vmul.f32 %v2069_v4, %v1664_v54  ;;  %v1691_v6 = vadd.f32 %v1754_v2, %v1685_v3 }
0x168a   :  { %v1686_v7 = vmul.f32 %v1753_v63, %v1680_v5  ;;  %1693 = vst.msk [vmem:[#allocation6] sm:$0xff] %vm150_vm4, %v1691_v6 }
0x168c   :  { %v1692_v8 = vadd.f32 %v1754_v2, %v1686_v7 }
0x168e   :  { %1694 = vst.msk [vmem:[#allocation6 + $0x8] sm:$0xff] %vm150_vm4, %v1692_v8 }
0x168f   :  { %2101 = shalt.err (!%p2098_p9)
}
0x1690   :  { %1706 = dma.vmem_to_hbm [thread:$0]  %s1701_s18, 256, %s2443_s3, [#allocation5], %s2115_s15, %s2115_s15, %s2116_s16  }
0x1691   :  { %2112 = dma.done.wait [#allocation5], 256  }
0x1692   :  { %2113 = vsyncadd [#allocation5], 4294967040 }
0x1693   :  { %1710 = vsyncpa [#allocation4], 1 }
0x1694   :  { %1711 = vsyncpa [#allocation5], 1 }

</bundles_post_ra>
